<compile_context>
chip_gen: v7x
topology: tpu7x:2x2x1
jax: 0.10.0
libtpu: 0.0.40
codegen_flags: <defaults>
</compile_context>

<pallas_src>
import functools
import itertools

import numpy as np
import jax
import jax.numpy as jnp
from jax.experimental import pallas as pl
from jax.experimental.pallas import tpu as pltpu


# ----------------------------------------------------------------------------
# Fused encoder kernel (one grid step == one image).
# ----------------------------------------------------------------------------
def _encoder_kernel(x_ref, w1s_ref, b1_ref, sel2_ref, w2_ref, b2_ref,
                    w3_ref, b3_ref, o_ref, h1_ref, *, oh1, ow1, oh2, ow2):
    f32 = jnp.float32
    bf16 = jnp.bfloat16
    c1 = b1_ref.shape[1]
    c2 = b2_ref.shape[1]

    # ---------------- conv1: 3x3 / stride 2 / pad 1 (+ ReLU) ----------------
    # x_ref holds the space-to-depth(2) of the halo-padded image:
    #   x_ref[0, I, J, (p*2+q)*Cin + c] == x_pad[2I+p, 2J+q, c]
    # so each of the 4 (Dy, Dx) shifts is a *unit-stride* window and the nine
    # 3x3 taps collapse into 4 small matmuls with pre-combined weights w1s.
    for oy in range(oh1):
        acc = jnp.zeros((ow1, c1), f32)
        for s in range(4):
            dy, dx = s // 2, s % 2
            lhs = x_ref[0, oy + dy, dx:dx + ow1, :]           # (ow1, 4*Cin) bf16
            acc = acc + jnp.dot(lhs, w1s_ref[s], preferred_element_type=f32)
        acc = jnp.maximum(acc + b1_ref[...], 0.0)             # bias + ReLU (f32)
        h1_ref[oy * ow1:(oy + 1) * ow1, :] = acc              # f32 scratch

    h1 = h1_ref[...].astype(bf16)                             # (oh1*ow1, c1)

    # ---------------- conv2: 3x3 / stride 2 / pad 1 (+ ReLU) ----------------
    # sel2[t] is a constant 0/1 matrix gathering the stride-2-shifted rows of
    # h1 for tap t (zero rows where the tap falls into padding), so each tap is
    # two small MXU matmuls and no strided memory access is needed.
    acc2 = jnp.zeros((oh2 * ow2, c2), f32)
    for t in range(9):
        gathered = jnp.dot(sel2_ref[t], h1, preferred_element_type=f32)
        acc2 = acc2 + jnp.dot(gathered.astype(bf16), w2_ref[t],
                              preferred_element_type=f32)
    h2 = jnp.maximum(acc2 + b2_ref[...], 0.0).astype(bf16)    # (oh2*ow2, c2)

    # ---------------- conv3: 1x1 --------------------------------------------
    out = jnp.dot(h2, w3_ref[...], preferred_element_type=f32) + b3_ref[...]
    o_ref[0] = out.astype(o_ref.dtype)


# ----------------------------------------------------------------------------
# Parameter / constant packing (tiny, runs at trace time under jit).
# ----------------------------------------------------------------------------
def _pack_conv1_weights(w1):
    """w1: (3,3,cin,c1) HWIO -> (4, 4*cin, c1) shift-combined weights for the
    space-to-depth(2) input (shift s=(Dy,Dx); K enumerates (p,q,c))."""
    _, _, cin, c1 = w1.shape
    w1s = jnp.zeros((4, 4 * cin, c1), jnp.float32)
    for Dy in range(2):
        for Dx in range(2):
            for p in range(2):
                for q in range(2):
                    dy, dx = 2 * Dy + p, 2 * Dx + q
                    if dy < 3 and dx < 3:
                        s = Dy * 2 + Dx
                        k0 = (p * 2 + q) * cin
                        w1s = w1s.at[s, k0:k0 + cin, :].set(
                            w1[dy, dx].astype(jnp.float32))
    return w1s


def _conv2_selection(oh1, ow1, oh2, ow2):
    """sel[t, u*ow2+v, oy*ow1+ox] = 1 iff (oy,ox) == (2u+dy-1, 2v+dx-1) in-range."""
    sel = np.zeros((9, oh2 * ow2, oh1 * ow1), np.float32)
    for t, (dy, dx) in enumerate(itertools.product(range(3), range(3))):
        for u in range(oh2):
            for v in range(ow2):
                oy, ox = 2 * u + dy - 1, 2 * v + dx - 1
                if 0 <= oy < oh1 and 0 <= ox < ow1:
                    sel[t, u * ow2 + v, oy * ow1 + ox] = 1.0
    return sel


# ----------------------------------------------------------------------------
# Encoder: deterministic parameter init + fused forward
# ----------------------------------------------------------------------------
def init_encoder_params(key, in_dim=1, latent_dim=16):
    def conv_init(k, kh, kw, cin, cout):
        kw_key, kb_key = jax.random.split(k)
        fan_in = kh * kw * cin
        bound = 1.0 / jnp.sqrt(fan_in)       # PyTorch default Conv2d init range
        w = jax.random.uniform(kw_key, (kh, kw, cin, cout), jnp.float32, -bound, bound)
        b = jax.random.uniform(kb_key, (cout,), jnp.float32, -bound, bound)
        return w, b

    k1, k2, k3 = jax.random.split(key, 3)
    return {
        "conv1": conv_init(k1, 3, 3, in_dim, 32),
        "conv2": conv_init(k2, 3, 3, 32, 64),
        "conv3": conv_init(k3, 1, 1, 64, latent_dim),
    }


def encoder_forward(params, x_nchw):
    w1, b1 = params["conv1"]          # (3,3,cin,32), (32,)
    w2, b2 = params["conv2"]          # (3,3,32,64),  (64,)
    w3, b3 = params["conv3"]          # (1,1,64,L),   (L,)

    N, cin, H, W = x_nchw.shape
    assert H % 2 == 0 and W % 2 == 0, "even spatial dims expected"
    c1, c2 = w1.shape[3], w2.shape[3]
    latent = w3.shape[3]
    oh1, ow1 = H // 2, W // 2          # conv1 output (k=3, s=2, p=1, even H/W)
    oh2, ow2 = oh1 // 2, ow1 // 2      # conv2 output
    assert oh1 % 2 == 0 and ow1 % 2 == 0

    # --- input: NCHW -> NHWC, halo pad, space-to-depth(2), bf16 (cheap glue) ---
    x = jnp.transpose(x_nchw, (0, 2, 3, 1)).astype(jnp.float32)
    xp = jnp.pad(x, ((0, 0), (1, 1), (1, 1), (0, 0)))
    hp, wp = H + 2, W + 2
    x_s2d = xp.reshape(N, hp // 2, 2, wp // 2, 2, cin)
    x_s2d = x_s2d.transpose(0, 1, 3, 2, 4, 5).reshape(N, hp // 2, wp // 2, 4 * cin)
    x_s2d = x_s2d.astype(jnp.bfloat16)

    # --- kernel-ready parameters / constants (stay resident in VMEM) ---
    w1s = _pack_conv1_weights(w1).astype(jnp.bfloat16)          # (4, 4*cin, c1)
    w2p = w2.reshape(9, c1, c2).astype(jnp.bfloat16)            # tap-major
    w3p = w3.reshape(c2, latent).astype(jnp.bfloat16)
    b1p = b1.reshape(1, c1).astype(jnp.float32)
    b2p = b2.reshape(1, c2).astype(jnp.float32)
    b3p = b3.reshape(1, latent).astype(jnp.float32)
    sel2 = jnp.asarray(_conv2_selection(oh1, ow1, oh2, ow2), jnp.bfloat16)

    kernel = functools.partial(_encoder_kernel, oh1=oh1, ow1=ow1, oh2=oh2, ow2=ow2)
    out = pl.pallas_call(
        kernel,
        out_shape=jax.ShapeDtypeStruct((N, oh2 * ow2, latent), jnp.float32),
        grid=(N,),
        in_specs=[
            pl.BlockSpec((1, hp // 2, wp // 2, 4 * cin), lambda b: (b, 0, 0, 0)),
            pl.BlockSpec((4, 4 * cin, c1), lambda b: (0, 0, 0)),
            pl.BlockSpec((1, c1), lambda b: (0, 0)),
            pl.BlockSpec((9, oh2 * ow2, oh1 * ow1), lambda b: (0, 0, 0)),
            pl.BlockSpec((9, c1, c2), lambda b: (0, 0, 0)),
            pl.BlockSpec((1, c2), lambda b: (0, 0)),
            pl.BlockSpec((c2, latent), lambda b: (0, 0)),
            pl.BlockSpec((1, latent), lambda b: (0, 0)),
        ],
        out_specs=pl.BlockSpec((1, oh2 * ow2, latent), lambda b: (b, 0, 0)),
        scratch_shapes=[pltpu.VMEM((oh1 * ow1, c1), jnp.float32)],
        compiler_params=pltpu.CompilerParams(dimension_semantics=("parallel",)),
    )(x_s2d, w1s, b1p, sel2, w2p, b2p, w3p, b3p)

    # (N, oh2*ow2, latent) -> NCHW
    return out.reshape(N, oh2, ow2, latent).transpose(0, 3, 1, 2)


# ----------------------------------------------------------------------------
# Pure-JAX reference (lax.conv, f32) for a silent correctness check
# ----------------------------------------------------------------------------
def encoder_reference(params, x_nchw):
    x = x_nchw.astype(jnp.float32)

    def conv(x, w_hwio, b, stride, padding):
        w = jnp.transpose(w_hwio, (3, 2, 0, 1))   # HWIO -> OIHW
        y = jax.lax.conv_general_dilated(
            x, w, window_strides=(stride, stride),
            padding=[(padding, padding), (padding, padding)],
            dimension_numbers=("NCHW", "OIHW", "NCHW"))
        return y + b.reshape(1, -1, 1, 1)

    w1, b1 = params["conv1"]
    w2, b2 = params["conv2"]
    w3, b3 = params["conv3"]
    h = jax.nn.relu(conv(x, w1, b1, 2, 1))
    h = jax.nn.relu(conv(h, w2, b2, 2, 1))
    return conv(h, w3, b3, 1, 0)


if __name__ == "__main__":
    key = jax.random.PRNGKey(0)
    pkey, xkey = jax.random.split(key)

    in_dim, latent_dim = 1, 16
    params = init_encoder_params(pkey, in_dim=in_dim, latent_dim=latent_dim)

    # Small MNIST-like input: batch=2, channels=1, 16x16 spatial (NCHW).
    x = jax.random.normal(xkey, (2, in_dim, 16, 16), dtype=jnp.float32)

    fwd = jax.jit(encoder_forward)
    out = jax.block_until_ready(fwd(params, x))
    assert out.shape == (2, latent_dim, 4, 4), out.shape

    ref = jax.block_until_ready(encoder_reference(params, x))
    # bf16 MXU inputs (f32 accumulate) -> loosen tolerance vs. the f32 reference.
    tol = 5e-2 * max(1.0, float(jnp.max(jnp.abs(ref))))
    err = float(jnp.max(jnp.abs(out - ref)))
    assert err < tol, (err, tol)

    print("KERNEL_OK")
</pallas_src>

<mosaic_0001>
module attributes {stable_mosaic.version = 11 : i64} {
  func.func @_encoder_kernel(%arg0: i32, %arg1: memref<1x9x9x4xbf16, #tpu.memory_space<vmem>>, %arg2: memref<4x4x32xbf16, #tpu.memory_space<vmem>>, %arg3: memref<1x32xf32, #tpu.memory_space<vmem>>, %arg4: memref<9x16x64xbf16, #tpu.memory_space<vmem>>, %arg5: memref<9x32x64xbf16, #tpu.memory_space<vmem>>, %arg6: memref<1x64xf32, #tpu.memory_space<vmem>>, %arg7: memref<64x16xbf16, #tpu.memory_space<vmem>>, %arg8: memref<1x16xf32, #tpu.memory_space<vmem>>, %arg9: memref<1x16x16xf32, #tpu.memory_space<vmem>>, %arg10: memref<64x32xf32, #tpu.memory_space<vmem>>) attributes {dimension_semantics = [#tpu.dimension_semantics<parallel>], iteration_bounds = array<i64: 2>, scalar_prefetch = 0 : i64, scratch_operands = 1 : i64, tpu.core_type = #tpu.core_type<tc>, window_params = [{transform_indices = @transform_0, window_bounds = array<i64: 1, 9, 9, 4>}, {pipeline_mode = #tpu.pipeline_mode<synchronous>, transform_indices = @transform_1, window_bounds = array<i64: 4, 4, 32>}, {pipeline_mode = #tpu.pipeline_mode<synchronous>, transform_indices = @transform_2, window_bounds = array<i64: 1, 32>}, {pipeline_mode = #tpu.pipeline_mode<synchronous>, transform_indices = @transform_3, window_bounds = array<i64: 9, 16, 64>}, {pipeline_mode = #tpu.pipeline_mode<synchronous>, transform_indices = @transform_4, window_bounds = array<i64: 9, 32, 64>}, {pipeline_mode = #tpu.pipeline_mode<synchronous>, transform_indices = @transform_5, window_bounds = array<i64: 1, 64>}, {pipeline_mode = #tpu.pipeline_mode<synchronous>, transform_indices = @transform_6, window_bounds = array<i64: 64, 16>}, {pipeline_mode = #tpu.pipeline_mode<synchronous>, transform_indices = @transform_7, window_bounds = array<i64: 1, 16>}, {transform_indices = @transform_8, window_bounds = array<i64: 1, 16, 16>}]} {
    %cst = arith.constant 0.000000e+00 : f32
    %0 = vector.broadcast %cst : f32 to vector<8x32xf32>
    %c0 = arith.constant 0 : index
    %c0_0 = arith.constant 0 : index
    %c0_1 = arith.constant 0 : index
    %c0_2 = arith.constant 0 : index
    %1 = vector.load %arg1[%c0, %c0_0, %c0_1, %c0_2] : memref<1x9x9x4xbf16, #tpu.memory_space<vmem>>, vector<1x1x8x4xbf16>
    %2 = vector.shape_cast %1 : vector<1x1x8x4xbf16> to vector<8x4xbf16>
    %c0_3 = arith.constant 0 : index
    %c0_4 = arith.constant 0 : index
    %c0_5 = arith.constant 0 : index
    %3 = vector.load %arg2[%c0_3, %c0_4, %c0_5] : memref<4x4x32xbf16, #tpu.memory_space<vmem>>, vector<1x4x32xbf16>
    %4 = vector.shape_cast %3 : vector<1x4x32xbf16> to vector<4x32xbf16>
    %cst_6 = arith.constant dense<0.000000e+00> : vector<8x32xf32>
    %5 = tpu.matmul %2, %4, %cst_6 {dimension_numbers = #tpu.dot_dimension_numbers<[1], [0], [0], [1], [0, 0, 1, 1], [], []>} : vector<8x4xbf16>, vector<4x32xbf16>, vector<8x32xf32> -> vector<8x32xf32>
    %6 = arith.addf %0, %5 : vector<8x32xf32>
    %c0_7 = arith.constant 0 : index
    %c0_8 = arith.constant 0 : index
    %c1 = arith.constant 1 : index
    %c0_9 = arith.constant 0 : index
    %7 = vector.load %arg1[%c0_7, %c0_8, %c1, %c0_9] : memref<1x9x9x4xbf16, #tpu.memory_space<vmem>>, vector<1x1x8x4xbf16>
    %8 = vector.shape_cast %7 : vector<1x1x8x4xbf16> to vector<8x4xbf16>
    %c1_10 = arith.constant 1 : index
    %c0_11 = arith.constant 0 : index
    %c0_12 = arith.constant 0 : index
    %9 = vector.load %arg2[%c1_10, %c0_11, %c0_12] : memref<4x4x32xbf16, #tpu.memory_space<vmem>>, vector<1x4x32xbf16>
    %10 = vector.shape_cast %9 : vector<1x4x32xbf16> to vector<4x32xbf16>
    %cst_13 = arith.constant dense<0.000000e+00> : vector<8x32xf32>
    %11 = tpu.matmul %8, %10, %cst_13 {dimension_numbers = #tpu.dot_dimension_numbers<[1], [0], [0], [1], [0, 0, 1, 1], [], []>} : vector<8x4xbf16>, vector<4x32xbf16>, vector<8x32xf32> -> vector<8x32xf32>
    %12 = arith.addf %6, %11 : vector<8x32xf32>
    %c0_14 = arith.constant 0 : index
    %c1_15 = arith.constant 1 : index
    %c0_16 = arith.constant 0 : index
    %c0_17 = arith.constant 0 : index
    %13 = vector.load %arg1[%c0_14, %c1_15, %c0_16, %c0_17] : memref<1x9x9x4xbf16, #tpu.memory_space<vmem>>, vector<1x1x8x4xbf16>
    %14 = vector.shape_cast %13 : vector<1x1x8x4xbf16> to vector<8x4xbf16>
    %c2 = arith.constant 2 : index
    %c0_18 = arith.constant 0 : index
    %c0_19 = arith.constant 0 : index
    %15 = vector.load %arg2[%c2, %c0_18, %c0_19] : memref<4x4x32xbf16, #tpu.memory_space<vmem>>, vector<1x4x32xbf16>
    %16 = vector.shape_cast %15 : vector<1x4x32xbf16> to vector<4x32xbf16>
    %cst_20 = arith.constant dense<0.000000e+00> : vector<8x32xf32>
    %17 = tpu.matmul %14, %16, %cst_20 {dimension_numbers = #tpu.dot_dimension_numbers<[1], [0], [0], [1], [0, 0, 1, 1], [], []>} : vector<8x4xbf16>, vector<4x32xbf16>, vector<8x32xf32> -> vector<8x32xf32>
    %18 = arith.addf %12, %17 : vector<8x32xf32>
    %c0_21 = arith.constant 0 : index
    %c1_22 = arith.constant 1 : index
    %c1_23 = arith.constant 1 : index
    %c0_24 = arith.constant 0 : index
    %19 = vector.load %arg1[%c0_21, %c1_22, %c1_23, %c0_24] : memref<1x9x9x4xbf16, #tpu.memory_space<vmem>>, vector<1x1x8x4xbf16>
    %20 = vector.shape_cast %19 : vector<1x1x8x4xbf16> to vector<8x4xbf16>
    %c3 = arith.constant 3 : index
    %c0_25 = arith.constant 0 : index
    %c0_26 = arith.constant 0 : index
    %21 = vector.load %arg2[%c3, %c0_25, %c0_26] : memref<4x4x32xbf16, #tpu.memory_space<vmem>>, vector<1x4x32xbf16>
    %22 = vector.shape_cast %21 : vector<1x4x32xbf16> to vector<4x32xbf16>
    %cst_27 = arith.constant dense<0.000000e+00> : vector<8x32xf32>
    %23 = tpu.matmul %20, %22, %cst_27 {dimension_numbers = #tpu.dot_dimension_numbers<[1], [0], [0], [1], [0, 0, 1, 1], [], []>} : vector<8x4xbf16>, vector<4x32xbf16>, vector<8x32xf32> -> vector<8x32xf32>
    %24 = arith.addf %18, %23 : vector<8x32xf32>
    %c0_28 = arith.constant 0 : index
    %c0_29 = arith.constant 0 : index
    %25 = vector.load %arg3[%c0_28, %c0_29] : memref<1x32xf32, #tpu.memory_space<vmem>>, vector<1x32xf32>
    %26 = vector.broadcast %25 : vector<1x32xf32> to vector<8x32xf32>
    %27 = arith.addf %24, %26 : vector<8x32xf32>
    %cst_30 = arith.constant 0.000000e+00 : f32
    %28 = vector.broadcast %cst_30 : f32 to vector<8x32xf32>
    %29 = arith.maximumf %27, %28 : vector<8x32xf32>
    %c0_31 = arith.constant 0 : index
    %c0_32 = arith.constant 0 : index
    %30 = vector.load %arg10[%c0_31, %c0_32] : memref<64x32xf32, #tpu.memory_space<vmem>>, vector<8x32xf32>
    tpu.vector_store %arg10[%c0_31, %c0_32], %29 {strides = array<i32>} : memref<64x32xf32, #tpu.memory_space<vmem>>, vector<8x32xf32>,
    %cst_33 = arith.constant 0.000000e+00 : f32
    %31 = vector.broadcast %cst_33 : f32 to vector<8x32xf32>
    %c0_34 = arith.constant 0 : index
    %c1_35 = arith.constant 1 : index
    %c0_36 = arith.constant 0 : index
    %c0_37 = arith.constant 0 : index
    %32 = vector.load %arg1[%c0_34, %c1_35, %c0_36, %c0_37] : memref<1x9x9x4xbf16, #tpu.memory_space<vmem>>, vector<1x1x8x4xbf16>
    %33 = vector.shape_cast %32 : vector<1x1x8x4xbf16> to vector<8x4xbf16>
    %c0_38 = arith.constant 0 : index
    %c0_39 = arith.constant 0 : index
    %c0_40 = arith.constant 0 : index
    %34 = vector.load %arg2[%c0_38, %c0_39, %c0_40] : memref<4x4x32xbf16, #tpu.memory_space<vmem>>, vector<1x4x32xbf16>
    %35 = vector.shape_cast %34 : vector<1x4x32xbf16> to vector<4x32xbf16>
    %cst_41 = arith.constant dense<0.000000e+00> : vector<8x32xf32>
    %36 = tpu.matmul %33, %35, %cst_41 {dimension_numbers = #tpu.dot_dimension_numbers<[1], [0], [0], [1], [0, 0, 1, 1], [], []>} : vector<8x4xbf16>, vector<4x32xbf16>, vector<8x32xf32> -> vector<8x32xf32>
    %37 = arith.addf %31, %36 : vector<8x32xf32>
    %c0_42 = arith.constant 0 : index
    %c1_43 = arith.constant 1 : index
    %c1_44 = arith.constant 1 : index
    %c0_45 = arith.constant 0 : index
    %38 = vector.load %arg1[%c0_42, %c1_43, %c1_44, %c0_45] : memref<1x9x9x4xbf16, #tpu.memory_space<vmem>>, vector<1x1x8x4xbf16>
    %39 = vector.shape_cast %38 : vector<1x1x8x4xbf16> to vector<8x4xbf16>
    %c1_46 = arith.constant 1 : index
    %c0_47 = arith.constant 0 : index
    %c0_48 = arith.constant 0 : index
    %40 = vector.load %arg2[%c1_46, %c0_47, %c0_48] : memref<4x4x32xbf16, #tpu.memory_space<vmem>>, vector<1x4x32xbf16>
    %41 = vector.shape_cast %40 : vector<1x4x32xbf16> to vector<4x32xbf16>
    %cst_49 = arith.constant dense<0.000000e+00> : vector<8x32xf32>
    %42 = tpu.matmul %39, %41, %cst_49 {dimension_numbers = #tpu.dot_dimension_numbers<[1], [0], [0], [1], [0, 0, 1, 1], [], []>} : vector<8x4xbf16>, vector<4x32xbf16>, vector<8x32xf32> -> vector<8x32xf32>
    %43 = arith.addf %37, %42 : vector<8x32xf32>
    %c0_50 = arith.constant 0 : index
    %c2_51 = arith.constant 2 : index
    %c0_52 = arith.constant 0 : index
    %c0_53 = arith.constant 0 : index
    %44 = vector.load %arg1[%c0_50, %c2_51, %c0_52, %c0_53] : memref<1x9x9x4xbf16, #tpu.memory_space<vmem>>, vector<1x1x8x4xbf16>
    %45 = vector.shape_cast %44 : vector<1x1x8x4xbf16> to vector<8x4xbf16>
    %c2_54 = arith.constant 2 : index
    %c0_55 = arith.constant 0 : index
    %c0_56 = arith.constant 0 : index
    %46 = vector.load %arg2[%c2_54, %c0_55, %c0_56] : memref<4x4x32xbf16, #tpu.memory_space<vmem>>, vector<1x4x32xbf16>
    %47 = vector.shape_cast %46 : vector<1x4x32xbf16> to vector<4x32xbf16>
    %cst_57 = arith.constant dense<0.000000e+00> : vector<8x32xf32>
    %48 = tpu.matmul %45, %47, %cst_57 {dimension_numbers = #tpu.dot_dimension_numbers<[1], [0], [0], [1], [0, 0, 1, 1], [], []>} : vector<8x4xbf16>, vector<4x32xbf16>, vector<8x32xf32> -> vector<8x32xf32>
    %49 = arith.addf %43, %48 : vector<8x32xf32>
    %c0_58 = arith.constant 0 : index
    %c2_59 = arith.constant 2 : index
    %c1_60 = arith.constant 1 : index
    %c0_61 = arith.constant 0 : index
    %50 = vector.load %arg1[%c0_58, %c2_59, %c1_60, %c0_61] : memref<1x9x9x4xbf16, #tpu.memory_space<vmem>>, vector<1x1x8x4xbf16>
    %51 = vector.shape_cast %50 : vector<1x1x8x4xbf16> to vector<8x4xbf16>
    %c3_62 = arith.constant 3 : index
    %c0_63 = arith.constant 0 : index
    %c0_64 = arith.constant 0 : index
    %52 = vector.load %arg2[%c3_62, %c0_63, %c0_64] : memref<4x4x32xbf16, #tpu.memory_space<vmem>>, vector<1x4x32xbf16>
    %53 = vector.shape_cast %52 : vector<1x4x32xbf16> to vector<4x32xbf16>
    %cst_65 = arith.constant dense<0.000000e+00> : vector<8x32xf32>
    %54 = tpu.matmul %51, %53, %cst_65 {dimension_numbers = #tpu.dot_dimension_numbers<[1], [0], [0], [1], [0, 0, 1, 1], [], []>} : vector<8x4xbf16>, vector<4x32xbf16>, vector<8x32xf32> -> vector<8x32xf32>
    %55 = arith.addf %49, %54 : vector<8x32xf32>
    %c0_66 = arith.constant 0 : index
    %c0_67 = arith.constant 0 : index
    %56 = vector.load %arg3[%c0_66, %c0_67] : memref<1x32xf32, #tpu.memory_space<vmem>>, vector<1x32xf32>
    %57 = vector.broadcast %56 : vector<1x32xf32> to vector<8x32xf32>
    %58 = arith.addf %55, %57 : vector<8x32xf32>
    %cst_68 = arith.constant 0.000000e+00 : f32
    %59 = vector.broadcast %cst_68 : f32 to vector<8x32xf32>
    %60 = arith.maximumf %58, %59 : vector<8x32xf32>
    %c8 = arith.constant 8 : index
    %c0_69 = arith.constant 0 : index
    %61 = vector.load %arg10[%c8, %c0_69] : memref<64x32xf32, #tpu.memory_space<vmem>>, vector<8x32xf32>
    tpu.vector_store %arg10[%c8, %c0_69], %60 {strides = array<i32>} : memref<64x32xf32, #tpu.memory_space<vmem>>, vector<8x32xf32>,
    %cst_70 = arith.constant 0.000000e+00 : f32
    %62 = vector.broadcast %cst_70 : f32 to vector<8x32xf32>
    %c0_71 = arith.constant 0 : index
    %c2_72 = arith.constant 2 : index
    %c0_73 = arith.constant 0 : index
    %c0_74 = arith.constant 0 : index
    %63 = vector.load %arg1[%c0_71, %c2_72, %c0_73, %c0_74] : memref<1x9x9x4xbf16, #tpu.memory_space<vmem>>, vector<1x1x8x4xbf16>
    %64 = vector.shape_cast %63 : vector<1x1x8x4xbf16> to vector<8x4xbf16>
    %c0_75 = arith.constant 0 : index
    %c0_76 = arith.constant 0 : index
    %c0_77 = arith.constant 0 : index
    %65 = vector.load %arg2[%c0_75, %c0_76, %c0_77] : memref<4x4x32xbf16, #tpu.memory_space<vmem>>, vector<1x4x32xbf16>
    %66 = vector.shape_cast %65 : vector<1x4x32xbf16> to vector<4x32xbf16>
    %cst_78 = arith.constant dense<0.000000e+00> : vector<8x32xf32>
    %67 = tpu.matmul %64, %66, %cst_78 {dimension_numbers = #tpu.dot_dimension_numbers<[1], [0], [0], [1], [0, 0, 1, 1], [], []>} : vector<8x4xbf16>, vector<4x32xbf16>, vector<8x32xf32> -> vector<8x32xf32>
    %68 = arith.addf %62, %67 : vector<8x32xf32>
    %c0_79 = arith.constant 0 : index
    %c2_80 = arith.constant 2 : index
    %c1_81 = arith.constant 1 : index
    %c0_82 = arith.constant 0 : index
    %69 = vector.load %arg1[%c0_79, %c2_80, %c1_81, %c0_82] : memref<1x9x9x4xbf16, #tpu.memory_space<vmem>>, vector<1x1x8x4xbf16>
    %70 = vector.shape_cast %69 : vector<1x1x8x4xbf16> to vector<8x4xbf16>
    %c1_83 = arith.constant 1 : index
    %c0_84 = arith.constant 0 : index
    %c0_85 = arith.constant 0 : index
    %71 = vector.load %arg2[%c1_83, %c0_84, %c0_85] : memref<4x4x32xbf16, #tpu.memory_space<vmem>>, vector<1x4x32xbf16>
    %72 = vector.shape_cast %71 : vector<1x4x32xbf16> to vector<4x32xbf16>
    %cst_86 = arith.constant dense<0.000000e+00> : vector<8x32xf32>
    %73 = tpu.matmul %70, %72, %cst_86 {dimension_numbers = #tpu.dot_dimension_numbers<[1], [0], [0], [1], [0, 0, 1, 1], [], []>} : vector<8x4xbf16>, vector<4x32xbf16>, vector<8x32xf32> -> vector<8x32xf32>
    %74 = arith.addf %68, %73 : vector<8x32xf32>
    %c0_87 = arith.constant 0 : index
    %c3_88 = arith.constant 3 : index
    %c0_89 = arith.constant 0 : index
    %c0_90 = arith.constant 0 : index
    %75 = vector.load %arg1[%c0_87, %c3_88, %c0_89, %c0_90] : memref<1x9x9x4xbf16, #tpu.memory_space<vmem>>, vector<1x1x8x4xbf16>
    %76 = vector.shape_cast %75 : vector<1x1x8x4xbf16> to vector<8x4xbf16>
    %c2_91 = arith.constant 2 : index
    %c0_92 = arith.constant 0 : index
    %c0_93 = arith.constant 0 : index
    %77 = vector.load %arg2[%c2_91, %c0_92, %c0_93] : memref<4x4x32xbf16, #tpu.memory_space<vmem>>, vector<1x4x32xbf16>
    %78 = vector.shape_cast %77 : vector<1x4x32xbf16> to vector<4x32xbf16>
    %cst_94 = arith.constant dense<0.000000e+00> : vector<8x32xf32>
    %79 = tpu.matmul %76, %78, %cst_94 {dimension_numbers = #tpu.dot_dimension_numbers<[1], [0], [0], [1], [0, 0, 1, 1], [], []>} : vector<8x4xbf16>, vector<4x32xbf16>, vector<8x32xf32> -> vector<8x32xf32>
    %80 = arith.addf %74, %79 : vector<8x32xf32>
    %c0_95 = arith.constant 0 : index
    %c3_96 = arith.constant 3 : index
    %c1_97 = arith.constant 1 : index
    %c0_98 = arith.constant 0 : index
    %81 = vector.load %arg1[%c0_95, %c3_96, %c1_97, %c0_98] : memref<1x9x9x4xbf16, #tpu.memory_space<vmem>>, vector<1x1x8x4xbf16>
    %82 = vector.shape_cast %81 : vector<1x1x8x4xbf16> to vector<8x4xbf16>
    %c3_99 = arith.constant 3 : index
    %c0_100 = arith.constant 0 : index
    %c0_101 = arith.constant 0 : index
    %83 = vector.load %arg2[%c3_99, %c0_100, %c0_101] : memref<4x4x32xbf16, #tpu.memory_space<vmem>>, vector<1x4x32xbf16>
    %84 = vector.shape_cast %83 : vector<1x4x32xbf16> to vector<4x32xbf16>
    %cst_102 = arith.constant dense<0.000000e+00> : vector<8x32xf32>
    %85 = tpu.matmul %82, %84, %cst_102 {dimension_numbers = #tpu.dot_dimension_numbers<[1], [0], [0], [1], [0, 0, 1, 1], [], []>} : vector<8x4xbf16>, vector<4x32xbf16>, vector<8x32xf32> -> vector<8x32xf32>
    %86 = arith.addf %80, %85 : vector<8x32xf32>
    %c0_103 = arith.constant 0 : index
    %c0_104 = arith.constant 0 : index
    %87 = vector.load %arg3[%c0_103, %c0_104] : memref<1x32xf32, #tpu.memory_space<vmem>>, vector<1x32xf32>
    %88 = vector.broadcast %87 : vector<1x32xf32> to vector<8x32xf32>
    %89 = arith.addf %86, %88 : vector<8x32xf32>
    %cst_105 = arith.constant 0.000000e+00 : f32
    %90 = vector.broadcast %cst_105 : f32 to vector<8x32xf32>
    %91 = arith.maximumf %89, %90 : vector<8x32xf32>
    %c16 = arith.constant 16 : index
    %c0_106 = arith.constant 0 : index
    %92 = vector.load %arg10[%c16, %c0_106] : memref<64x32xf32, #tpu.memory_space<vmem>>, vector<8x32xf32>
    tpu.vector_store %arg10[%c16, %c0_106], %91 {strides = array<i32>} : memref<64x32xf32, #tpu.memory_space<vmem>>, vector<8x32xf32>,
    %cst_107 = arith.constant 0.000000e+00 : f32
    %93 = vector.broadcast %cst_107 : f32 to vector<8x32xf32>
    %c0_108 = arith.constant 0 : index
    %c3_109 = arith.constant 3 : index
    %c0_110 = arith.constant 0 : index
    %c0_111 = arith.constant 0 : index
    %94 = vector.load %arg1[%c0_108, %c3_109, %c0_110, %c0_111] : memref<1x9x9x4xbf16, #tpu.memory_space<vmem>>, vector<1x1x8x4xbf16>
    %95 = vector.shape_cast %94 : vector<1x1x8x4xbf16> to vector<8x4xbf16>
    %c0_112 = arith.constant 0 : index
    %c0_113 = arith.constant 0 : index
    %c0_114 = arith.constant 0 : index
    %96 = vector.load %arg2[%c0_112, %c0_113, %c0_114] : memref<4x4x32xbf16, #tpu.memory_space<vmem>>, vector<1x4x32xbf16>
    %97 = vector.shape_cast %96 : vector<1x4x32xbf16> to vector<4x32xbf16>
    %cst_115 = arith.constant dense<0.000000e+00> : vector<8x32xf32>
    %98 = tpu.matmul %95, %97, %cst_115 {dimension_numbers = #tpu.dot_dimension_numbers<[1], [0], [0], [1], [0, 0, 1, 1], [], []>} : vector<8x4xbf16>, vector<4x32xbf16>, vector<8x32xf32> -> vector<8x32xf32>
    %99 = arith.addf %93, %98 : vector<8x32xf32>
    %c0_116 = arith.constant 0 : index
    %c3_117 = arith.constant 3 : index
    %c1_118 = arith.constant 1 : index
    %c0_119 = arith.constant 0 : index
    %100 = vector.load %arg1[%c0_116, %c3_117, %c1_118, %c0_119] : memref<1x9x9x4xbf16, #tpu.memory_space<vmem>>, vector<1x1x8x4xbf16>
    %101 = vector.shape_cast %100 : vector<1x1x8x4xbf16> to vector<8x4xbf16>
    %c1_120 = arith.constant 1 : index
    %c0_121 = arith.constant 0 : index
    %c0_122 = arith.constant 0 : index
    %102 = vector.load %arg2[%c1_120, %c0_121, %c0_122] : memref<4x4x32xbf16, #tpu.memory_space<vmem>>, vector<1x4x32xbf16>
    %103 = vector.shape_cast %102 : vector<1x4x32xbf16> to vector<4x32xbf16>
    %cst_123 = arith.constant dense<0.000000e+00> : vector<8x32xf32>
    %104 = tpu.matmul %101, %103, %cst_123 {dimension_numbers = #tpu.dot_dimension_numbers<[1], [0], [0], [1], [0, 0, 1, 1], [], []>} : vector<8x4xbf16>, vector<4x32xbf16>, vector<8x32xf32> -> vector<8x32xf32>
    %105 = arith.addf %99, %104 : vector<8x32xf32>
    %c0_124 = arith.constant 0 : index
    %c4 = arith.constant 4 : index
    %c0_125 = arith.constant 0 : index
    %c0_126 = arith.constant 0 : index
    %106 = vector.load %arg1[%c0_124, %c4, %c0_125, %c0_126] : memref<1x9x9x4xbf16, #tpu.memory_space<vmem>>, vector<1x1x8x4xbf16>
    %107 = vector.shape_cast %106 : vector<1x1x8x4xbf16> to vector<8x4xbf16>
    %c2_127 = arith.constant 2 : index
    %c0_128 = arith.constant 0 : index
    %c0_129 = arith.constant 0 : index
    %108 = vector.load %arg2[%c2_127, %c0_128, %c0_129] : memref<4x4x32xbf16, #tpu.memory_space<vmem>>, vector<1x4x32xbf16>
    %109 = vector.shape_cast %108 : vector<1x4x32xbf16> to vector<4x32xbf16>
    %cst_130 = arith.constant dense<0.000000e+00> : vector<8x32xf32>
    %110 = tpu.matmul %107, %109, %cst_130 {dimension_numbers = #tpu.dot_dimension_numbers<[1], [0], [0], [1], [0, 0, 1, 1], [], []>} : vector<8x4xbf16>, vector<4x32xbf16>, vector<8x32xf32> -> vector<8x32xf32>
    %111 = arith.addf %105, %110 : vector<8x32xf32>
    %c0_131 = arith.constant 0 : index
    %c4_132 = arith.constant 4 : index
    %c1_133 = arith.constant 1 : index
    %c0_134 = arith.constant 0 : index
    %112 = vector.load %arg1[%c0_131, %c4_132, %c1_133, %c0_134] : memref<1x9x9x4xbf16, #tpu.memory_space<vmem>>, vector<1x1x8x4xbf16>
    %113 = vector.shape_cast %112 : vector<1x1x8x4xbf16> to vector<8x4xbf16>
    %c3_135 = arith.constant 3 : index
    %c0_136 = arith.constant 0 : index
    %c0_137 = arith.constant 0 : index
    %114 = vector.load %arg2[%c3_135, %c0_136, %c0_137] : memref<4x4x32xbf16, #tpu.memory_space<vmem>>, vector<1x4x32xbf16>
    %115 = vector.shape_cast %114 : vector<1x4x32xbf16> to vector<4x32xbf16>
    %cst_138 = arith.constant dense<0.000000e+00> : vector<8x32xf32>
    %116 = tpu.matmul %113, %115, %cst_138 {dimension_numbers = #tpu.dot_dimension_numbers<[1], [0], [0], [1], [0, 0, 1, 1], [], []>} : vector<8x4xbf16>, vector<4x32xbf16>, vector<8x32xf32> -> vector<8x32xf32>
    %117 = arith.addf %111, %116 : vector<8x32xf32>
    %c0_139 = arith.constant 0 : index
    %c0_140 = arith.constant 0 : index
    %118 = vector.load %arg3[%c0_139, %c0_140] : memref<1x32xf32, #tpu.memory_space<vmem>>, vector<1x32xf32>
    %119 = vector.broadcast %118 : vector<1x32xf32> to vector<8x32xf32>
    %120 = arith.addf %117, %119 : vector<8x32xf32>
    %cst_141 = arith.constant 0.000000e+00 : f32
    %121 = vector.broadcast %cst_141 : f32 to vector<8x32xf32>
    %122 = arith.maximumf %120, %121 : vector<8x32xf32>
    %c24 = arith.constant 24 : index
    %c0_142 = arith.constant 0 : index
    %123 = vector.load %arg10[%c24, %c0_142] : memref<64x32xf32, #tpu.memory_space<vmem>>, vector<8x32xf32>
    tpu.vector_store %arg10[%c24, %c0_142], %122 {strides = array<i32>} : memref<64x32xf32, #tpu.memory_space<vmem>>, vector<8x32xf32>,
    %cst_143 = arith.constant 0.000000e+00 : f32
    %124 = vector.broadcast %cst_143 : f32 to vector<8x32xf32>
    %c0_144 = arith.constant 0 : index
    %c4_145 = arith.constant 4 : index
    %c0_146 = arith.constant 0 : index
    %c0_147 = arith.constant 0 : index
    %125 = vector.load %arg1[%c0_144, %c4_145, %c0_146, %c0_147] : memref<1x9x9x4xbf16, #tpu.memory_space<vmem>>, vector<1x1x8x4xbf16>
    %126 = vector.shape_cast %125 : vector<1x1x8x4xbf16> to vector<8x4xbf16>
    %c0_148 = arith.constant 0 : index
    %c0_149 = arith.constant 0 : index
    %c0_150 = arith.constant 0 : index
    %127 = vector.load %arg2[%c0_148, %c0_149, %c0_150] : memref<4x4x32xbf16, #tpu.memory_space<vmem>>, vector<1x4x32xbf16>
    %128 = vector.shape_cast %127 : vector<1x4x32xbf16> to vector<4x32xbf16>
    %cst_151 = arith.constant dense<0.000000e+00> : vector<8x32xf32>
    %129 = tpu.matmul %126, %128, %cst_151 {dimension_numbers = #tpu.dot_dimension_numbers<[1], [0], [0], [1], [0, 0, 1, 1], [], []>} : vector<8x4xbf16>, vector<4x32xbf16>, vector<8x32xf32> -> vector<8x32xf32>
    %130 = arith.addf %124, %129 : vector<8x32xf32>
    %c0_152 = arith.constant 0 : index
    %c4_153 = arith.constant 4 : index
    %c1_154 = arith.constant 1 : index
    %c0_155 = arith.constant 0 : index
    %131 = vector.load %arg1[%c0_152, %c4_153, %c1_154, %c0_155] : memref<1x9x9x4xbf16, #tpu.memory_space<vmem>>, vector<1x1x8x4xbf16>
    %132 = vector.shape_cast %131 : vector<1x1x8x4xbf16> to vector<8x4xbf16>
    %c1_156 = arith.constant 1 : index
    %c0_157 = arith.constant 0 : index
    %c0_158 = arith.constant 0 : index
    %133 = vector.load %arg2[%c1_156, %c0_157, %c0_158] : memref<4x4x32xbf16, #tpu.memory_space<vmem>>, vector<1x4x32xbf16>
    %134 = vector.shape_cast %133 : vector<1x4x32xbf16> to vector<4x32xbf16>
    %cst_159 = arith.constant dense<0.000000e+00> : vector<8x32xf32>
    %135 = tpu.matmul %132, %134, %cst_159 {dimension_numbers = #tpu.dot_dimension_numbers<[1], [0], [0], [1], [0, 0, 1, 1], [], []>} : vector<8x4xbf16>, vector<4x32xbf16>, vector<8x32xf32> -> vector<8x32xf32>
    %136 = arith.addf %130, %135 : vector<8x32xf32>
    %c0_160 = arith.constant 0 : index
    %c5 = arith.constant 5 : index
    %c0_161 = arith.constant 0 : index
    %c0_162 = arith.constant 0 : index
    %137 = vector.load %arg1[%c0_160, %c5, %c0_161, %c0_162] : memref<1x9x9x4xbf16, #tpu.memory_space<vmem>>, vector<1x1x8x4xbf16>
    %138 = vector.shape_cast %137 : vector<1x1x8x4xbf16> to vector<8x4xbf16>
    %c2_163 = arith.constant 2 : index
    %c0_164 = arith.constant 0 : index
    %c0_165 = arith.constant 0 : index
    %139 = vector.load %arg2[%c2_163, %c0_164, %c0_165] : memref<4x4x32xbf16, #tpu.memory_space<vmem>>, vector<1x4x32xbf16>
    %140 = vector.shape_cast %139 : vector<1x4x32xbf16> to vector<4x32xbf16>
    %cst_166 = arith.constant dense<0.000000e+00> : vector<8x32xf32>
    %141 = tpu.matmul %138, %140, %cst_166 {dimension_numbers = #tpu.dot_dimension_numbers<[1], [0], [0], [1], [0, 0, 1, 1], [], []>} : vector<8x4xbf16>, vector<4x32xbf16>, vector<8x32xf32> -> vector<8x32xf32>
    %142 = arith.addf %136, %141 : vector<8x32xf32>
    %c0_167 = arith.constant 0 : index
    %c5_168 = arith.constant 5 : index
    %c1_169 = arith.constant 1 : index
    %c0_170 = arith.constant 0 : index
    %143 = vector.load %arg1[%c0_167, %c5_168, %c1_169, %c0_170] : memref<1x9x9x4xbf16, #tpu.memory_space<vmem>>, vector<1x1x8x4xbf16>
    %144 = vector.shape_cast %143 : vector<1x1x8x4xbf16> to vector<8x4xbf16>
    %c3_171 = arith.constant 3 : index
    %c0_172 = arith.constant 0 : index
    %c0_173 = arith.constant 0 : index
    %145 = vector.load %arg2[%c3_171, %c0_172, %c0_173] : memref<4x4x32xbf16, #tpu.memory_space<vmem>>, vector<1x4x32xbf16>
    %146 = vector.shape_cast %145 : vector<1x4x32xbf16> to vector<4x32xbf16>
    %cst_174 = arith.constant dense<0.000000e+00> : vector<8x32xf32>
    %147 = tpu.matmul %144, %146, %cst_174 {dimension_numbers = #tpu.dot_dimension_numbers<[1], [0], [0], [1], [0, 0, 1, 1], [], []>} : vector<8x4xbf16>, vector<4x32xbf16>, vector<8x32xf32> -> vector<8x32xf32>
    %148 = arith.addf %142, %147 : vector<8x32xf32>
    %c0_175 = arith.constant 0 : index
    %c0_176 = arith.constant 0 : index
    %149 = vector.load %arg3[%c0_175, %c0_176] : memref<1x32xf32, #tpu.memory_space<vmem>>, vector<1x32xf32>
    %150 = vector.broadcast %149 : vector<1x32xf32> to vector<8x32xf32>
    %151 = arith.addf %148, %150 : vector<8x32xf32>
    %cst_177 = arith.constant 0.000000e+00 : f32
    %152 = vector.broadcast %cst_177 : f32 to vector<8x32xf32>
    %153 = arith.maximumf %151, %152 : vector<8x32xf32>
    %c32 = arith.constant 32 : index
    %c0_178 = arith.constant 0 : index
    %154 = vector.load %arg10[%c32, %c0_178] : memref<64x32xf32, #tpu.memory_space<vmem>>, vector<8x32xf32>
    tpu.vector_store %arg10[%c32, %c0_178], %153 {strides = array<i32>} : memref<64x32xf32, #tpu.memory_space<vmem>>, vector<8x32xf32>,
    %cst_179 = arith.constant 0.000000e+00 : f32
    %155 = vector.broadcast %cst_179 : f32 to vector<8x32xf32>
    %c0_180 = arith.constant 0 : index
    %c5_181 = arith.constant 5 : index
    %c0_182 = arith.constant 0 : index
    %c0_183 = arith.constant 0 : index
    %156 = vector.load %arg1[%c0_180, %c5_181, %c0_182, %c0_183] : memref<1x9x9x4xbf16, #tpu.memory_space<vmem>>, vector<1x1x8x4xbf16>
    %157 = vector.shape_cast %156 : vector<1x1x8x4xbf16> to vector<8x4xbf16>
    %c0_184 = arith.constant 0 : index
    %c0_185 = arith.constant 0 : index
    %c0_186 = arith.constant 0 : index
    %158 = vector.load %arg2[%c0_184, %c0_185, %c0_186] : memref<4x4x32xbf16, #tpu.memory_space<vmem>>, vector<1x4x32xbf16>
    %159 = vector.shape_cast %158 : vector<1x4x32xbf16> to vector<4x32xbf16>
    %cst_187 = arith.constant dense<0.000000e+00> : vector<8x32xf32>
    %160 = tpu.matmul %157, %159, %cst_187 {dimension_numbers = #tpu.dot_dimension_numbers<[1], [0], [0], [1], [0, 0, 1, 1], [], []>} : vector<8x4xbf16>, vector<4x32xbf16>, vector<8x32xf32> -> vector<8x32xf32>
    %161 = arith.addf %155, %160 : vector<8x32xf32>
    %c0_188 = arith.constant 0 : index
    %c5_189 = arith.constant 5 : index
    %c1_190 = arith.constant 1 : index
    %c0_191 = arith.constant 0 : index
    %162 = vector.load %arg1[%c0_188, %c5_189, %c1_190, %c0_191] : memref<1x9x9x4xbf16, #tpu.memory_space<vmem>>, vector<1x1x8x4xbf16>
    %163 = vector.shape_cast %162 : vector<1x1x8x4xbf16> to vector<8x4xbf16>
    %c1_192 = arith.constant 1 : index
    %c0_193 = arith.constant 0 : index
    %c0_194 = arith.constant 0 : index
    %164 = vector.load %arg2[%c1_192, %c0_193, %c0_194] : memref<4x4x32xbf16, #tpu.memory_space<vmem>>, vector<1x4x32xbf16>
    %165 = vector.shape_cast %164 : vector<1x4x32xbf16> to vector<4x32xbf16>
    %cst_195 = arith.constant dense<0.000000e+00> : vector<8x32xf32>
    %166 = tpu.matmul %163, %165, %cst_195 {dimension_numbers = #tpu.dot_dimension_numbers<[1], [0], [0], [1], [0, 0, 1, 1], [], []>} : vector<8x4xbf16>, vector<4x32xbf16>, vector<8x32xf32> -> vector<8x32xf32>
    %167 = arith.addf %161, %166 : vector<8x32xf32>
    %c0_196 = arith.constant 0 : index
    %c6 = arith.constant 6 : index
    %c0_197 = arith.constant 0 : index
    %c0_198 = arith.constant 0 : index
    %168 = vector.load %arg1[%c0_196, %c6, %c0_197, %c0_198] : memref<1x9x9x4xbf16, #tpu.memory_space<vmem>>, vector<1x1x8x4xbf16>
    %169 = vector.shape_cast %168 : vector<1x1x8x4xbf16> to vector<8x4xbf16>
    %c2_199 = arith.constant 2 : index
    %c0_200 = arith.constant 0 : index
    %c0_201 = arith.constant 0 : index
    %170 = vector.load %arg2[%c2_199, %c0_200, %c0_201] : memref<4x4x32xbf16, #tpu.memory_space<vmem>>, vector<1x4x32xbf16>
    %171 = vector.shape_cast %170 : vector<1x4x32xbf16> to vector<4x32xbf16>
    %cst_202 = arith.constant dense<0.000000e+00> : vector<8x32xf32>
    %172 = tpu.matmul %169, %171, %cst_202 {dimension_numbers = #tpu.dot_dimension_numbers<[1], [0], [0], [1], [0, 0, 1, 1], [], []>} : vector<8x4xbf16>, vector<4x32xbf16>, vector<8x32xf32> -> vector<8x32xf32>
    %173 = arith.addf %167, %172 : vector<8x32xf32>
    %c0_203 = arith.constant 0 : index
    %c6_204 = arith.constant 6 : index
    %c1_205 = arith.constant 1 : index
    %c0_206 = arith.constant 0 : index
    %174 = vector.load %arg1[%c0_203, %c6_204, %c1_205, %c0_206] : memref<1x9x9x4xbf16, #tpu.memory_space<vmem>>, vector<1x1x8x4xbf16>
    %175 = vector.shape_cast %174 : vector<1x1x8x4xbf16> to vector<8x4xbf16>
    %c3_207 = arith.constant 3 : index
    %c0_208 = arith.constant 0 : index
    %c0_209 = arith.constant 0 : index
    %176 = vector.load %arg2[%c3_207, %c0_208, %c0_209] : memref<4x4x32xbf16, #tpu.memory_space<vmem>>, vector<1x4x32xbf16>
    %177 = vector.shape_cast %176 : vector<1x4x32xbf16> to vector<4x32xbf16>
    %cst_210 = arith.constant dense<0.000000e+00> : vector<8x32xf32>
    %178 = tpu.matmul %175, %177, %cst_210 {dimension_numbers = #tpu.dot_dimension_numbers<[1], [0], [0], [1], [0, 0, 1, 1], [], []>} : vector<8x4xbf16>, vector<4x32xbf16>, vector<8x32xf32> -> vector<8x32xf32>
    %179 = arith.addf %173, %178 : vector<8x32xf32>
    %c0_211 = arith.constant 0 : index
    %c0_212 = arith.constant 0 : index
    %180 = vector.load %arg3[%c0_211, %c0_212] : memref<1x32xf32, #tpu.memory_space<vmem>>, vector<1x32xf32>
    %181 = vector.broadcast %180 : vector<1x32xf32> to vector<8x32xf32>
    %182 = arith.addf %179, %181 : vector<8x32xf32>
    %cst_213 = arith.constant 0.000000e+00 : f32
    %183 = vector.broadcast %cst_213 : f32 to vector<8x32xf32>
    %184 = arith.maximumf %182, %183 : vector<8x32xf32>
    %c40 = arith.constant 40 : index
    %c0_214 = arith.constant 0 : index
    %185 = vector.load %arg10[%c40, %c0_214] : memref<64x32xf32, #tpu.memory_space<vmem>>, vector<8x32xf32>
    tpu.vector_store %arg10[%c40, %c0_214], %184 {strides = array<i32>} : memref<64x32xf32, #tpu.memory_space<vmem>>, vector<8x32xf32>,
    %cst_215 = arith.constant 0.000000e+00 : f32
    %186 = vector.broadcast %cst_215 : f32 to vector<8x32xf32>
    %c0_216 = arith.constant 0 : index
    %c6_217 = arith.constant 6 : index
    %c0_218 = arith.constant 0 : index
    %c0_219 = arith.constant 0 : index
    %187 = vector.load %arg1[%c0_216, %c6_217, %c0_218, %c0_219] : memref<1x9x9x4xbf16, #tpu.memory_space<vmem>>, vector<1x1x8x4xbf16>
    %188 = vector.shape_cast %187 : vector<1x1x8x4xbf16> to vector<8x4xbf16>
    %c0_220 = arith.constant 0 : index
    %c0_221 = arith.constant 0 : index
    %c0_222 = arith.constant 0 : index
    %189 = vector.load %arg2[%c0_220, %c0_221, %c0_222] : memref<4x4x32xbf16, #tpu.memory_space<vmem>>, vector<1x4x32xbf16>
    %190 = vector.shape_cast %189 : vector<1x4x32xbf16> to vector<4x32xbf16>
    %cst_223 = arith.constant dense<0.000000e+00> : vector<8x32xf32>
    %191 = tpu.matmul %188, %190, %cst_223 {dimension_numbers = #tpu.dot_dimension_numbers<[1], [0], [0], [1], [0, 0, 1, 1], [], []>} : vector<8x4xbf16>, vector<4x32xbf16>, vector<8x32xf32> -> vector<8x32xf32>
    %192 = arith.addf %186, %191 : vector<8x32xf32>
    %c0_224 = arith.constant 0 : index
    %c6_225 = arith.constant 6 : index
    %c1_226 = arith.constant 1 : index
    %c0_227 = arith.constant 0 : index
    %193 = vector.load %arg1[%c0_224, %c6_225, %c1_226, %c0_227] : memref<1x9x9x4xbf16, #tpu.memory_space<vmem>>, vector<1x1x8x4xbf16>
    %194 = vector.shape_cast %193 : vector<1x1x8x4xbf16> to vector<8x4xbf16>
    %c1_228 = arith.constant 1 : index
    %c0_229 = arith.constant 0 : index
    %c0_230 = arith.constant 0 : index
    %195 = vector.load %arg2[%c1_228, %c0_229, %c0_230] : memref<4x4x32xbf16, #tpu.memory_space<vmem>>, vector<1x4x32xbf16>
    %196 = vector.shape_cast %195 : vector<1x4x32xbf16> to vector<4x32xbf16>
    %cst_231 = arith.constant dense<0.000000e+00> : vector<8x32xf32>
    %197 = tpu.matmul %194, %196, %cst_231 {dimension_numbers = #tpu.dot_dimension_numbers<[1], [0], [0], [1], [0, 0, 1, 1], [], []>} : vector<8x4xbf16>, vector<4x32xbf16>, vector<8x32xf32> -> vector<8x32xf32>
    %198 = arith.addf %192, %197 : vector<8x32xf32>
    %c0_232 = arith.constant 0 : index
    %c7 = arith.constant 7 : index
    %c0_233 = arith.constant 0 : index
    %c0_234 = arith.constant 0 : index
    %199 = vector.load %arg1[%c0_232, %c7, %c0_233, %c0_234] : memref<1x9x9x4xbf16, #tpu.memory_space<vmem>>, vector<1x1x8x4xbf16>
    %200 = vector.shape_cast %199 : vector<1x1x8x4xbf16> to vector<8x4xbf16>
    %c2_235 = arith.constant 2 : index
    %c0_236 = arith.constant 0 : index
    %c0_237 = arith.constant 0 : index
    %201 = vector.load %arg2[%c2_235, %c0_236, %c0_237] : memref<4x4x32xbf16, #tpu.memory_space<vmem>>, vector<1x4x32xbf16>
    %202 = vector.shape_cast %201 : vector<1x4x32xbf16> to vector<4x32xbf16>
    %cst_238 = arith.constant dense<0.000000e+00> : vector<8x32xf32>
    %203 = tpu.matmul %200, %202, %cst_238 {dimension_numbers = #tpu.dot_dimension_numbers<[1], [0], [0], [1], [0, 0, 1, 1], [], []>} : vector<8x4xbf16>, vector<4x32xbf16>, vector<8x32xf32> -> vector<8x32xf32>
    %204 = arith.addf %198, %203 : vector<8x32xf32>
    %c0_239 = arith.constant 0 : index
    %c7_240 = arith.constant 7 : index
    %c1_241 = arith.constant 1 : index
    %c0_242 = arith.constant 0 : index
    %205 = vector.load %arg1[%c0_239, %c7_240, %c1_241, %c0_242] : memref<1x9x9x4xbf16, #tpu.memory_space<vmem>>, vector<1x1x8x4xbf16>
    %206 = vector.shape_cast %205 : vector<1x1x8x4xbf16> to vector<8x4xbf16>
    %c3_243 = arith.constant 3 : index
    %c0_244 = arith.constant 0 : index
    %c0_245 = arith.constant 0 : index
    %207 = vector.load %arg2[%c3_243, %c0_244, %c0_245] : memref<4x4x32xbf16, #tpu.memory_space<vmem>>, vector<1x4x32xbf16>
    %208 = vector.shape_cast %207 : vector<1x4x32xbf16> to vector<4x32xbf16>
    %cst_246 = arith.constant dense<0.000000e+00> : vector<8x32xf32>
    %209 = tpu.matmul %206, %208, %cst_246 {dimension_numbers = #tpu.dot_dimension_numbers<[1], [0], [0], [1], [0, 0, 1, 1], [], []>} : vector<8x4xbf16>, vector<4x32xbf16>, vector<8x32xf32> -> vector<8x32xf32>
    %210 = arith.addf %204, %209 : vector<8x32xf32>
    %c0_247 = arith.constant 0 : index
    %c0_248 = arith.constant 0 : index
    %211 = vector.load %arg3[%c0_247, %c0_248] : memref<1x32xf32, #tpu.memory_space<vmem>>, vector<1x32xf32>
    %212 = vector.broadcast %211 : vector<1x32xf32> to vector<8x32xf32>
    %213 = arith.addf %210, %212 : vector<8x32xf32>
    %cst_249 = arith.constant 0.000000e+00 : f32
    %214 = vector.broadcast %cst_249 : f32 to vector<8x32xf32>
    %215 = arith.maximumf %213, %214 : vector<8x32xf32>
    %c48 = arith.constant 48 : index
    %c0_250 = arith.constant 0 : index
    %216 = vector.load %arg10[%c48, %c0_250] : memref<64x32xf32, #tpu.memory_space<vmem>>, vector<8x32xf32>
    tpu.vector_store %arg10[%c48, %c0_250], %215 {strides = array<i32>} : memref<64x32xf32, #tpu.memory_space<vmem>>, vector<8x32xf32>,
    %cst_251 = arith.constant 0.000000e+00 : f32
    %217 = vector.broadcast %cst_251 : f32 to vector<8x32xf32>
    %c0_252 = arith.constant 0 : index
    %c7_253 = arith.constant 7 : index
    %c0_254 = arith.constant 0 : index
    %c0_255 = arith.constant 0 : index
    %218 = vector.load %arg1[%c0_252, %c7_253, %c0_254, %c0_255] : memref<1x9x9x4xbf16, #tpu.memory_space<vmem>>, vector<1x1x8x4xbf16>
    %219 = vector.shape_cast %218 : vector<1x1x8x4xbf16> to vector<8x4xbf16>
    %c0_256 = arith.constant 0 : index
    %c0_257 = arith.constant 0 : index
    %c0_258 = arith.constant 0 : index
    %220 = vector.load %arg2[%c0_256, %c0_257, %c0_258] : memref<4x4x32xbf16, #tpu.memory_space<vmem>>, vector<1x4x32xbf16>
    %221 = vector.shape_cast %220 : vector<1x4x32xbf16> to vector<4x32xbf16>
    %cst_259 = arith.constant dense<0.000000e+00> : vector<8x32xf32>
    %222 = tpu.matmul %219, %221, %cst_259 {dimension_numbers = #tpu.dot_dimension_numbers<[1], [0], [0], [1], [0, 0, 1, 1], [], []>} : vector<8x4xbf16>, vector<4x32xbf16>, vector<8x32xf32> -> vector<8x32xf32>
    %223 = arith.addf %217, %222 : vector<8x32xf32>
    %c0_260 = arith.constant 0 : index
    %c7_261 = arith.constant 7 : index
    %c1_262 = arith.constant 1 : index
    %c0_263 = arith.constant 0 : index
    %224 = vector.load %arg1[%c0_260, %c7_261, %c1_262, %c0_263] : memref<1x9x9x4xbf16, #tpu.memory_space<vmem>>, vector<1x1x8x4xbf16>
    %225 = vector.shape_cast %224 : vector<1x1x8x4xbf16> to vector<8x4xbf16>
    %c1_264 = arith.constant 1 : index
    %c0_265 = arith.constant 0 : index
    %c0_266 = arith.constant 0 : index
    %226 = vector.load %arg2[%c1_264, %c0_265, %c0_266] : memref<4x4x32xbf16, #tpu.memory_space<vmem>>, vector<1x4x32xbf16>
    %227 = vector.shape_cast %226 : vector<1x4x32xbf16> to vector<4x32xbf16>
    %cst_267 = arith.constant dense<0.000000e+00> : vector<8x32xf32>
    %228 = tpu.matmul %225, %227, %cst_267 {dimension_numbers = #tpu.dot_dimension_numbers<[1], [0], [0], [1], [0, 0, 1, 1], [], []>} : vector<8x4xbf16>, vector<4x32xbf16>, vector<8x32xf32> -> vector<8x32xf32>
    %229 = arith.addf %223, %228 : vector<8x32xf32>
    %c0_268 = arith.constant 0 : index
    %c8_269 = arith.constant 8 : index
    %c0_270 = arith.constant 0 : index
    %c0_271 = arith.constant 0 : index
    %230 = vector.load %arg1[%c0_268, %c8_269, %c0_270, %c0_271] : memref<1x9x9x4xbf16, #tpu.memory_space<vmem>>, vector<1x1x8x4xbf16>
    %231 = vector.shape_cast %230 : vector<1x1x8x4xbf16> to vector<8x4xbf16>
    %c2_272 = arith.constant 2 : index
    %c0_273 = arith.constant 0 : index
    %c0_274 = arith.constant 0 : index
    %232 = vector.load %arg2[%c2_272, %c0_273, %c0_274] : memref<4x4x32xbf16, #tpu.memory_space<vmem>>, vector<1x4x32xbf16>
    %233 = vector.shape_cast %232 : vector<1x4x32xbf16> to vector<4x32xbf16>
    %cst_275 = arith.constant dense<0.000000e+00> : vector<8x32xf32>
    %234 = tpu.matmul %231, %233, %cst_275 {dimension_numbers = #tpu.dot_dimension_numbers<[1], [0], [0], [1], [0, 0, 1, 1], [], []>} : vector<8x4xbf16>, vector<4x32xbf16>, vector<8x32xf32> -> vector<8x32xf32>
    %235 = arith.addf %229, %234 : vector<8x32xf32>
    %c0_276 = arith.constant 0 : index
    %c8_277 = arith.constant 8 : index
    %c1_278 = arith.constant 1 : index
    %c0_279 = arith.constant 0 : index
    %236 = vector.load %arg1[%c0_276, %c8_277, %c1_278, %c0_279] : memref<1x9x9x4xbf16, #tpu.memory_space<vmem>>, vector<1x1x8x4xbf16>
    %237 = vector.shape_cast %236 : vector<1x1x8x4xbf16> to vector<8x4xbf16>
    %c3_280 = arith.constant 3 : index
    %c0_281 = arith.constant 0 : index
    %c0_282 = arith.constant 0 : index
    %238 = vector.load %arg2[%c3_280, %c0_281, %c0_282] : memref<4x4x32xbf16, #tpu.memory_space<vmem>>, vector<1x4x32xbf16>
    %239 = vector.shape_cast %238 : vector<1x4x32xbf16> to vector<4x32xbf16>
    %cst_283 = arith.constant dense<0.000000e+00> : vector<8x32xf32>
    %240 = tpu.matmul %237, %239, %cst_283 {dimension_numbers = #tpu.dot_dimension_numbers<[1], [0], [0], [1], [0, 0, 1, 1], [], []>} : vector<8x4xbf16>, vector<4x32xbf16>, vector<8x32xf32> -> vector<8x32xf32>
    %241 = arith.addf %235, %240 : vector<8x32xf32>
    %c0_284 = arith.constant 0 : index
    %c0_285 = arith.constant 0 : index
    %242 = vector.load %arg3[%c0_284, %c0_285] : memref<1x32xf32, #tpu.memory_space<vmem>>, vector<1x32xf32>
    %243 = vector.broadcast %242 : vector<1x32xf32> to vector<8x32xf32>
    %244 = arith.addf %241, %243 : vector<8x32xf32>
    %cst_286 = arith.constant 0.000000e+00 : f32
    %245 = vector.broadcast %cst_286 : f32 to vector<8x32xf32>
    %246 = arith.maximumf %244, %245 : vector<8x32xf32>
    %c56 = arith.constant 56 : index
    %c0_287 = arith.constant 0 : index
    %247 = vector.load %arg10[%c56, %c0_287] : memref<64x32xf32, #tpu.memory_space<vmem>>, vector<8x32xf32>
    tpu.vector_store %arg10[%c56, %c0_287], %246 {strides = array<i32>} : memref<64x32xf32, #tpu.memory_space<vmem>>, vector<8x32xf32>,
    %c0_288 = arith.constant 0 : index
    %c0_289 = arith.constant 0 : index
    %248 = vector.load %arg10[%c0_288, %c0_289] : memref<64x32xf32, #tpu.memory_space<vmem>>, vector<64x32xf32>
    %249 = arith.truncf %248 : vector<64x32xf32> to vector<64x32xbf16>
    %cst_290 = arith.constant 0.000000e+00 : f32
    %250 = vector.broadcast %cst_290 : f32 to vector<16x64xf32>
    %c0_291 = arith.constant 0 : index
    %c0_292 = arith.constant 0 : index
    %c0_293 = arith.constant 0 : index
    %251 = vector.load %arg4[%c0_291, %c0_292, %c0_293] : memref<9x16x64xbf16, #tpu.memory_space<vmem>>, vector<1x16x64xbf16>
    %252 = vector.shape_cast %251 : vector<1x16x64xbf16> to vector<16x64xbf16>
    %cst_294 = arith.constant dense<0.000000e+00> : vector<16x32xf32>
    %253 = tpu.matmul %252, %249, %cst_294 {dimension_numbers = #tpu.dot_dimension_numbers<[1], [0], [0], [1], [0, 0, 1, 1], [], []>} : vector<16x64xbf16>, vector<64x32xbf16>, vector<16x32xf32> -> vector<16x32xf32>
    %254 = arith.truncf %253 : vector<16x32xf32> to vector<16x32xbf16>
    %c0_295 = arith.constant 0 : index
    %c0_296 = arith.constant 0 : index
    %c0_297 = arith.constant 0 : index
    %255 = vector.load %arg5[%c0_295, %c0_296, %c0_297] : memref<9x32x64xbf16, #tpu.memory_space<vmem>>, vector<1x32x64xbf16>
    %256 = vector.shape_cast %255 : vector<1x32x64xbf16> to vector<32x64xbf16>
    %cst_298 = arith.constant dense<0.000000e+00> : vector<16x64xf32>
    %257 = tpu.matmul %254, %256, %cst_298 {dimension_numbers = #tpu.dot_dimension_numbers<[1], [0], [0], [1], [0, 0, 1, 1], [], []>} : vector<16x32xbf16>, vector<32x64xbf16>, vector<16x64xf32> -> vector<16x64xf32>
    %258 = arith.addf %250, %257 : vector<16x64xf32>
    %c1_299 = arith.constant 1 : index
    %c0_300 = arith.constant 0 : index
    %c0_301 = arith.constant 0 : index
    %259 = vector.load %arg4[%c1_299, %c0_300, %c0_301] : memref<9x16x64xbf16, #tpu.memory_space<vmem>>, vector<1x16x64xbf16>
    %260 = vector.shape_cast %259 : vector<1x16x64xbf16> to vector<16x64xbf16>
    %cst_302 = arith.constant dense<0.000000e+00> : vector<16x32xf32>
    %261 = tpu.matmul %260, %249, %cst_302 {dimension_numbers = #tpu.dot_dimension_numbers<[1], [0], [0], [1], [0, 0, 1, 1], [], []>} : vector<16x64xbf16>, vector<64x32xbf16>, vector<16x32xf32> -> vector<16x32xf32>
    %262 = arith.truncf %261 : vector<16x32xf32> to vector<16x32xbf16>
    %c1_303 = arith.constant 1 : index
    %c0_304 = arith.constant 0 : index
    %c0_305 = arith.constant 0 : index
    %263 = vector.load %arg5[%c1_303, %c0_304, %c0_305] : memref<9x32x64xbf16, #tpu.memory_space<vmem>>, vector<1x32x64xbf16>
    %264 = vector.shape_cast %263 : vector<1x32x64xbf16> to vector<32x64xbf16>
    %cst_306 = arith.constant dense<0.000000e+00> : vector<16x64xf32>
    %265 = tpu.matmul %262, %264, %cst_306 {dimension_numbers = #tpu.dot_dimension_numbers<[1], [0], [0], [1], [0, 0, 1, 1], [], []>} : vector<16x32xbf16>, vector<32x64xbf16>, vector<16x64xf32> -> vector<16x64xf32>
    %266 = arith.addf %258, %265 : vector<16x64xf32>
    %c2_307 = arith.constant 2 : index
    %c0_308 = arith.constant 0 : index
    %c0_309 = arith.constant 0 : index
    %267 = vector.load %arg4[%c2_307, %c0_308, %c0_309] : memref<9x16x64xbf16, #tpu.memory_space<vmem>>, vector<1x16x64xbf16>
    %268 = vector.shape_cast %267 : vector<1x16x64xbf16> to vector<16x64xbf16>
    %cst_310 = arith.constant dense<0.000000e+00> : vector<16x32xf32>
    %269 = tpu.matmul %268, %249, %cst_310 {dimension_numbers = #tpu.dot_dimension_numbers<[1], [0], [0], [1], [0, 0, 1, 1], [], []>} : vector<16x64xbf16>, vector<64x32xbf16>, vector<16x32xf32> -> vector<16x32xf32>
    %270 = arith.truncf %269 : vector<16x32xf32> to vector<16x32xbf16>
    %c2_311 = arith.constant 2 : index
    %c0_312 = arith.constant 0 : index
    %c0_313 = arith.constant 0 : index
    %271 = vector.load %arg5[%c2_311, %c0_312, %c0_313] : memref<9x32x64xbf16, #tpu.memory_space<vmem>>, vector<1x32x64xbf16>
    %272 = vector.shape_cast %271 : vector<1x32x64xbf16> to vector<32x64xbf16>
    %cst_314 = arith.constant dense<0.000000e+00> : vector<16x64xf32>
    %273 = tpu.matmul %270, %272, %cst_314 {dimension_numbers = #tpu.dot_dimension_numbers<[1], [0], [0], [1], [0, 0, 1, 1], [], []>} : vector<16x32xbf16>, vector<32x64xbf16>, vector<16x64xf32> -> vector<16x64xf32>
    %274 = arith.addf %266, %273 : vector<16x64xf32>
    %c3_315 = arith.constant 3 : index
    %c0_316 = arith.constant 0 : index
    %c0_317 = arith.constant 0 : index
    %275 = vector.load %arg4[%c3_315, %c0_316, %c0_317] : memref<9x16x64xbf16, #tpu.memory_space<vmem>>, vector<1x16x64xbf16>
    %276 = vector.shape_cast %275 : vector<1x16x64xbf16> to vector<16x64xbf16>
    %cst_318 = arith.constant dense<0.000000e+00> : vector<16x32xf32>
    %277 = tpu.matmul %276, %249, %cst_318 {dimension_numbers = #tpu.dot_dimension_numbers<[1], [0], [0], [1], [0, 0, 1, 1], [], []>} : vector<16x64xbf16>, vector<64x32xbf16>, vector<16x32xf32> -> vector<16x32xf32>
    %278 = arith.truncf %277 : vector<16x32xf32> to vector<16x32xbf16>
    %c3_319 = arith.constant 3 : index
    %c0_320 = arith.constant 0 : index
    %c0_321 = arith.constant 0 : index
    %279 = vector.load %arg5[%c3_319, %c0_320, %c0_321] : memref<9x32x64xbf16, #tpu.memory_space<vmem>>, vector<1x32x64xbf16>
    %280 = vector.shape_cast %279 : vector<1x32x64xbf16> to vector<32x64xbf16>
    %cst_322 = arith.constant dense<0.000000e+00> : vector<16x64xf32>
    %281 = tpu.matmul %278, %280, %cst_322 {dimension_numbers = #tpu.dot_dimension_numbers<[1], [0], [0], [1], [0, 0, 1, 1], [], []>} : vector<16x32xbf16>, vector<32x64xbf16>, vector<16x64xf32> -> vector<16x64xf32>
    %282 = arith.addf %274, %281 : vector<16x64xf32>
    %c4_323 = arith.constant 4 : index
    %c0_324 = arith.constant 0 : index
    %c0_325 = arith.constant 0 : index
    %283 = vector.load %arg4[%c4_323, %c0_324, %c0_325] : memref<9x16x64xbf16, #tpu.memory_space<vmem>>, vector<1x16x64xbf16>
    %284 = vector.shape_cast %283 : vector<1x16x64xbf16> to vector<16x64xbf16>
    %cst_326 = arith.constant dense<0.000000e+00> : vector<16x32xf32>
    %285 = tpu.matmul %284, %249, %cst_326 {dimension_numbers = #tpu.dot_dimension_numbers<[1], [0], [0], [1], [0, 0, 1, 1], [], []>} : vector<16x64xbf16>, vector<64x32xbf16>, vector<16x32xf32> -> vector<16x32xf32>
    %286 = arith.truncf %285 : vector<16x32xf32> to vector<16x32xbf16>
    %c4_327 = arith.constant 4 : index
    %c0_328 = arith.constant 0 : index
    %c0_329 = arith.constant 0 : index
    %287 = vector.load %arg5[%c4_327, %c0_328, %c0_329] : memref<9x32x64xbf16, #tpu.memory_space<vmem>>, vector<1x32x64xbf16>
    %288 = vector.shape_cast %287 : vector<1x32x64xbf16> to vector<32x64xbf16>
    %cst_330 = arith.constant dense<0.000000e+00> : vector<16x64xf32>
    %289 = tpu.matmul %286, %288, %cst_330 {dimension_numbers = #tpu.dot_dimension_numbers<[1], [0], [0], [1], [0, 0, 1, 1], [], []>} : vector<16x32xbf16>, vector<32x64xbf16>, vector<16x64xf32> -> vector<16x64xf32>
    %290 = arith.addf %282, %289 : vector<16x64xf32>
    %c5_331 = arith.constant 5 : index
    %c0_332 = arith.constant 0 : index
    %c0_333 = arith.constant 0 : index
    %291 = vector.load %arg4[%c5_331, %c0_332, %c0_333] : memref<9x16x64xbf16, #tpu.memory_space<vmem>>, vector<1x16x64xbf16>
    %292 = vector.shape_cast %291 : vector<1x16x64xbf16> to vector<16x64xbf16>
    %cst_334 = arith.constant dense<0.000000e+00> : vector<16x32xf32>
    %293 = tpu.matmul %292, %249, %cst_334 {dimension_numbers = #tpu.dot_dimension_numbers<[1], [0], [0], [1], [0, 0, 1, 1], [], []>} : vector<16x64xbf16>, vector<64x32xbf16>, vector<16x32xf32> -> vector<16x32xf32>
    %294 = arith.truncf %293 : vector<16x32xf32> to vector<16x32xbf16>
    %c5_335 = arith.constant 5 : index
    %c0_336 = arith.constant 0 : index
    %c0_337 = arith.constant 0 : index
    %295 = vector.load %arg5[%c5_335, %c0_336, %c0_337] : memref<9x32x64xbf16, #tpu.memory_space<vmem>>, vector<1x32x64xbf16>
    %296 = vector.shape_cast %295 : vector<1x32x64xbf16> to vector<32x64xbf16>
    %cst_338 = arith.constant dense<0.000000e+00> : vector<16x64xf32>
    %297 = tpu.matmul %294, %296, %cst_338 {dimension_numbers = #tpu.dot_dimension_numbers<[1], [0], [0], [1], [0, 0, 1, 1], [], []>} : vector<16x32xbf16>, vector<32x64xbf16>, vector<16x64xf32> -> vector<16x64xf32>
    %298 = arith.addf %290, %297 : vector<16x64xf32>
    %c6_339 = arith.constant 6 : index
    %c0_340 = arith.constant 0 : index
    %c0_341 = arith.constant 0 : index
    %299 = vector.load %arg4[%c6_339, %c0_340, %c0_341] : memref<9x16x64xbf16, #tpu.memory_space<vmem>>, vector<1x16x64xbf16>
    %300 = vector.shape_cast %299 : vector<1x16x64xbf16> to vector<16x64xbf16>
    %cst_342 = arith.constant dense<0.000000e+00> : vector<16x32xf32>
    %301 = tpu.matmul %300, %249, %cst_342 {dimension_numbers = #tpu.dot_dimension_numbers<[1], [0], [0], [1], [0, 0, 1, 1], [], []>} : vector<16x64xbf16>, vector<64x32xbf16>, vector<16x32xf32> -> vector<16x32xf32>
    %302 = arith.truncf %301 : vector<16x32xf32> to vector<16x32xbf16>
    %c6_343 = arith.constant 6 : index
    %c0_344 = arith.constant 0 : index
    %c0_345 = arith.constant 0 : index
    %303 = vector.load %arg5[%c6_343, %c0_344, %c0_345] : memref<9x32x64xbf16, #tpu.memory_space<vmem>>, vector<1x32x64xbf16>
    %304 = vector.shape_cast %303 : vector<1x32x64xbf16> to vector<32x64xbf16>
    %cst_346 = arith.constant dense<0.000000e+00> : vector<16x64xf32>
    %305 = tpu.matmul %302, %304, %cst_346 {dimension_numbers = #tpu.dot_dimension_numbers<[1], [0], [0], [1], [0, 0, 1, 1], [], []>} : vector<16x32xbf16>, vector<32x64xbf16>, vector<16x64xf32> -> vector<16x64xf32>
    %306 = arith.addf %298, %305 : vector<16x64xf32>
    %c7_347 = arith.constant 7 : index
    %c0_348 = arith.constant 0 : index
    %c0_349 = arith.constant 0 : index
    %307 = vector.load %arg4[%c7_347, %c0_348, %c0_349] : memref<9x16x64xbf16, #tpu.memory_space<vmem>>, vector<1x16x64xbf16>
    %308 = vector.shape_cast %307 : vector<1x16x64xbf16> to vector<16x64xbf16>
    %cst_350 = arith.constant dense<0.000000e+00> : vector<16x32xf32>
    %309 = tpu.matmul %308, %249, %cst_350 {dimension_numbers = #tpu.dot_dimension_numbers<[1], [0], [0], [1], [0, 0, 1, 1], [], []>} : vector<16x64xbf16>, vector<64x32xbf16>, vector<16x32xf32> -> vector<16x32xf32>
    %310 = arith.truncf %309 : vector<16x32xf32> to vector<16x32xbf16>
    %c7_351 = arith.constant 7 : index
    %c0_352 = arith.constant 0 : index
    %c0_353 = arith.constant 0 : index
    %311 = vector.load %arg5[%c7_351, %c0_352, %c0_353] : memref<9x32x64xbf16, #tpu.memory_space<vmem>>, vector<1x32x64xbf16>
    %312 = vector.shape_cast %311 : vector<1x32x64xbf16> to vector<32x64xbf16>
    %cst_354 = arith.constant dense<0.000000e+00> : vector<16x64xf32>
    %313 = tpu.matmul %310, %312, %cst_354 {dimension_numbers = #tpu.dot_dimension_numbers<[1], [0], [0], [1], [0, 0, 1, 1], [], []>} : vector<16x32xbf16>, vector<32x64xbf16>, vector<16x64xf32> -> vector<16x64xf32>
    %314 = arith.addf %306, %313 : vector<16x64xf32>
    %c8_355 = arith.constant 8 : index
    %c0_356 = arith.constant 0 : index
    %c0_357 = arith.constant 0 : index
    %315 = vector.load %arg4[%c8_355, %c0_356, %c0_357] : memref<9x16x64xbf16, #tpu.memory_space<vmem>>, vector<1x16x64xbf16>
    %316 = vector.shape_cast %315 : vector<1x16x64xbf16> to vector<16x64xbf16>
    %cst_358 = arith.constant dense<0.000000e+00> : vector<16x32xf32>
    %317 = tpu.matmul %316, %249, %cst_358 {dimension_numbers = #tpu.dot_dimension_numbers<[1], [0], [0], [1], [0, 0, 1, 1], [], []>} : vector<16x64xbf16>, vector<64x32xbf16>, vector<16x32xf32> -> vector<16x32xf32>
    %318 = arith.truncf %317 : vector<16x32xf32> to vector<16x32xbf16>
    %c8_359 = arith.constant 8 : index
    %c0_360 = arith.constant 0 : index
    %c0_361 = arith.constant 0 : index
    %319 = vector.load %arg5[%c8_359, %c0_360, %c0_361] : memref<9x32x64xbf16, #tpu.memory_space<vmem>>, vector<1x32x64xbf16>
    %320 = vector.shape_cast %319 : vector<1x32x64xbf16> to vector<32x64xbf16>
    %cst_362 = arith.constant dense<0.000000e+00> : vector<16x64xf32>
    %321 = tpu.matmul %318, %320, %cst_362 {dimension_numbers = #tpu.dot_dimension_numbers<[1], [0], [0], [1], [0, 0, 1, 1], [], []>} : vector<16x32xbf16>, vector<32x64xbf16>, vector<16x64xf32> -> vector<16x64xf32>
    %322 = arith.addf %314, %321 : vector<16x64xf32>
    %c0_363 = arith.constant 0 : index
    %c0_364 = arith.constant 0 : index
    %323 = vector.load %arg6[%c0_363, %c0_364] : memref<1x64xf32, #tpu.memory_space<vmem>>, vector<1x64xf32>
    %324 = vector.broadcast %323 : vector<1x64xf32> to vector<16x64xf32>
    %325 = arith.addf %322, %324 : vector<16x64xf32>
    %cst_365 = arith.constant 0.000000e+00 : f32
    %326 = vector.broadcast %cst_365 : f32 to vector<16x64xf32>
    %327 = arith.maximumf %325, %326 : vector<16x64xf32>
    %328 = arith.truncf %327 : vector<16x64xf32> to vector<16x64xbf16>
    %c0_366 = arith.constant 0 : index
    %c0_367 = arith.constant 0 : index
    %329 = vector.load %arg7[%c0_366, %c0_367] : memref<64x16xbf16, #tpu.memory_space<vmem>>, vector<64x16xbf16>
    %cst_368 = arith.constant dense<0.000000e+00> : vector<16x16xf32>
    %330 = tpu.matmul %328, %329, %cst_368 {dimension_numbers = #tpu.dot_dimension_numbers<[1], [0], [0], [1], [0, 0, 1, 1], [], []>} : vector<16x64xbf16>, vector<64x16xbf16>, vector<16x16xf32> -> vector<16x16xf32>
    %c0_369 = arith.constant 0 : index
    %c0_370 = arith.constant 0 : index
    %331 = vector.load %arg8[%c0_369, %c0_370] : memref<1x16xf32, #tpu.memory_space<vmem>>, vector<1x16xf32>
    %332 = vector.broadcast %331 : vector<1x16xf32> to vector<16x16xf32>
    %333 = arith.addf %330, %332 : vector<16x16xf32>
    %c0_371 = arith.constant 0 : index
    %c0_372 = arith.constant 0 : index
    %c0_373 = arith.constant 0 : index
    %334 = vector.load %arg9[%c0_371, %c0_372, %c0_373] : memref<1x16x16xf32, #tpu.memory_space<vmem>>, vector<1x16x16xf32>
    %335 = vector.shape_cast %334 : vector<1x16x16xf32> to vector<16x16xf32>
    %336 = vector.shape_cast %333 : vector<16x16xf32> to vector<1x16x16xf32>
    tpu.vector_store %arg9[%c0_371, %c0_372, %c0_373], %336 {strides = array<i32>} : memref<1x16x16xf32, #tpu.memory_space<vmem>>, vector<1x16x16xf32>,
    return
  }
  func.func @transform_0(%arg0: i32) -> (i32, i32, i32, i32) {
    %c0_i32 = arith.constant 0 : i32
    %c0_i32_0 = arith.constant 0 : i32
    %c0_i32_1 = arith.constant 0 : i32
    %c0_i32_2 = arith.constant 0 : i32
    return %arg0, %c0_i32, %c0_i32_0, %c0_i32_1 : i32, i32, i32, i32
  }
  func.func @transform_1(%arg0: i32) -> (i32, i32, i32) {
    %c0_i32 = arith.constant 0 : i32
    %c0_i32_0 = arith.constant 0 : i32
    %c0_i32_1 = arith.constant 0 : i32
    %c0_i32_2 = arith.constant 0 : i32
    return %c0_i32, %c0_i32_0, %c0_i32_1 : i32, i32, i32
  }
  func.func @transform_2(%arg0: i32) -> (i32, i32) {
    %c0_i32 = arith.constant 0 : i32
    %c0_i32_0 = arith.constant 0 : i32
    %c0_i32_1 = arith.constant 0 : i32
    return %c0_i32, %c0_i32_0 : i32, i32
  }
  func.func @transform_3(%arg0: i32) -> (i32, i32, i32) {
    %c0_i32 = arith.constant 0 : i32
    %c0_i32_0 = arith.constant 0 : i32
    %c0_i32_1 = arith.constant 0 : i32
    %c0_i32_2 = arith.constant 0 : i32
    return %c0_i32, %c0_i32_0, %c0_i32_1 : i32, i32, i32
  }
  func.func @transform_4(%arg0: i32) -> (i32, i32, i32) {
    %c0_i32 = arith.constant 0 : i32
    %c0_i32_0 = arith.constant 0 : i32
    %c0_i32_1 = arith.constant 0 : i32
    %c0_i32_2 = arith.constant 0 : i32
    return %c0_i32, %c0_i32_0, %c0_i32_1 : i32, i32, i32
  }
  func.func @transform_5(%arg0: i32) -> (i32, i32) {
    %c0_i32 = arith.constant 0 : i32
    %c0_i32_0 = arith.constant 0 : i32
    %c0_i32_1 = arith.constant 0 : i32
    return %c0_i32, %c0_i32_0 : i32, i32
  }
  func.func @transform_6(%arg0: i32) -> (i32, i32) {
    %c0_i32 = arith.constant 0 : i32
    %c0_i32_0 = arith.constant 0 : i32
    %c0_i32_1 = arith.constant 0 : i32
    return %c0_i32, %c0_i32_0 : i32, i32
  }
  func.func @transform_7(%arg0: i32) -> (i32, i32) {
    %c0_i32 = arith.constant 0 : i32
    %c0_i32_0 = arith.constant 0 : i32
    %c0_i32_1 = arith.constant 0 : i32
    return %c0_i32, %c0_i32_0 : i32, i32
  }
  func.func @transform_8(%arg0: i32) -> (i32, i32, i32) {
    %c0_i32 = arith.constant 0 : i32
    %c0_i32_0 = arith.constant 0 : i32
    %c0_i32_1 = arith.constant 0 : i32
    return %arg0, %c0_i32, %c0_i32_0 : i32, i32, i32
  }
}

</mosaic_0001>

<bundles_post_ra>
// kernel: encoder_forward.1
= control target key start
LH: loop header
LB: loop body
LE: loop exit
PB: predicated region body
PF: predicated region fallthrough
CT: control target
= control target key end

     0   :  { %13 = vsyncpa [#allocation4], 0  ;;  %s5008_s0 = inlined_call_operand.vmem [shape: bf16[2,9,9,4], index: 0, kind: input, shape index: {}]   ;;  %s5009_s1 = inlined_call_operand.vmem [shape: bf16[4,4,32], index: 1, kind: input, shape index: {}]   ;;  %s5010_s2 = inlined_call_operand.vmem [shape: f32[1,32], index: 2, kind: input, shape index: {}]   ;;  %s5011_s3 = inlined_call_operand.vmem [shape: bf16[9,16,64], index: 3, kind: input, shape index: {}]   ;;  %s5012_s4 = inlined_call_operand.vmem [shape: bf16[9,32,64], index: 4, kind: input, shape index: {}]   ;;  %s5013_s5 = inlined_call_operand.vmem [shape: f32[1,64], index: 5, kind: input, shape index: {}]   ;;  %s5014_s6 = inlined_call_operand.vmem [shape: bf16[64,16], index: 6, kind: input, shape index: {}]   ;;  %s5015_s7 = inlined_call_operand.vmem [shape: f32[1,16], index: 7, kind: input, shape index: {}]   ;;  %s5016_s8 = inlined_call_operand.hbm [shape: f32[2,16,16], index: 8, kind: output, shape index: {}]  }
   0x1   :  { %15 = vsyncpa [#allocation4 + $0x1], 0  ;;  %s4336_s27 = smov 0   ;;  %s4338_s28 = smov 0  }
   0x2   :  { %s4340_s29 = smov 0   ;;  %s4342_s30 = smov 0  }
   0x3 LB: > { %s4357_s9 = sadd.s32 4294967295, %s4284_s30   ;;  %s3376_s10 = sadd.s32 4294967294, %s4284_s30   ;;  %s4284_s30 = sphi %s4342_s30, %s5022_s30   ;;  %s4280_s29 = sphi %s4340_s29, %s5021_s29   ;;  %s4276_s28 = sphi %s4338_s28, %s5020_s28   ;;  %s4272_s27 = sphi %s4336_s27, %s5019_s27  }
   0x4   : > { %s4361_s11 = sadd.s32 1, %s4284_s30   ;;  %s201_s12 = sadd.s32 1, %s4280_s29 }
   0x5   : > { %s198_s13 = ssub.s32 %s4284_s30, %s4361_s11  ;;  %p211_p0 = scmp.ne.s32.totalorder %s4280_s29, %s4276_s28 }
   0x6   : > { %p199_p1 = scmp.eq.s32.totalorder %s198_s13, 0  ;;  %p212_p2 = scmp.eq.s32.totalorder %s4357_s9, 1 }
   0x7   : > { %p217_p3 = scmp.ne.s32.totalorder %s4276_s28, %s4272_s27  ;;  %p218_p4 = scmp.eq.s32.totalorder %s3376_s10, 1 }
   0x8   : > { %s4372_s14 = scalar_select %p199_p1, %s4280_s29, %s201_s12  }
   0x9   : > { %p4374_p5 = por %p212_p2, %p211_p0  ;;  %p4378_p6 = por %p218_p4, %p217_p3 }
   0xa   : > { %p3379_p7 = scmp.ge.s32.totalorder %s4284_s30, 1  ;;  %p265_p8 = scmp.lt.s32.totalorder %s4284_s30, 3 }
   0xc   : > { %p266_p9 = pnand %p3379_p7, %p265_p8 }
   0xd   : > { %v3382_v0 = vld [vmem:[%s5009_s1 + $0x2] sm:$0x3] (!%p266_p9)  ;;  %vm326_vm0 = vcmask (!%p266_p9), 1041408   ;;  %v306_v1 = vld [vmem:[%s5009_s1] sm:$0x3] (!%p266_p9)  ;;  %v4286_v2 = vmov (!%p266_p9), 0.0  }
   0xe   : > { %269 = sbr.rel (%p266_p9) target bundleno = 2681 (0xa79), region = 52  ;;  %3747 = vmatprep.subr.bf16.mxu0 (!%p266_p9), %v4286_v2  ;;  %3753 = vmatprep.subr.bf16.mxu1 (!%p266_p9), %v4286_v2  ;;  %v328_v3 = vsel (!%p266_p9), %vm326_vm0, %v3382_v0, 0  ;;  %v374_v4 = vsel (!%p266_p9), %vm326_vm0, %v306_v1, 0  ;;  %p299_p10 = scmp.lt.s32.totalorder (!%p266_p9), %s4357_s9, 1  ;;  %vm4287_vm1 = vmmov (!%p266_p9), 0   ;;  %vm322_vm2 = vcmask (!%p266_p9), 31744  }
   0xf   : > { %3748 = vmatpush3.bf16.msra.mxu0 (!%p266_p9), %v328_v3  ;;  %3754 = vmatpush3.bf16.msra.mxu1 (!%p266_p9), %v374_v4  ;;  %v3391_v5 = vld [vmem:[%s5009_s1 + $0x6] sm:$0x3] (!%p266_p9)  ;;  %v3387_v15 = vld [vmem:[%s5009_s1 + $0x4] sm:$0x3] (!%p266_p9)  ;;  %v542_v18 = vld [vmem:[%s5009_s1] sm:$0x3] (!%p266_p9) }
  0x10   : > { %3755 = vmatprep.mubr.msk.bf16.mxu1 (!%p266_p9), %vm4287_vm1, %v4286_v2  ;;  %3749 = vmatprep.mubr.msk.bf16.mxu0 (!%p266_p9), %vm4287_vm1, %v4286_v2  ;;  %v487_v6 = vsel (!%p266_p9), %vm326_vm0, %v3391_v5, 0  ;;  %v424_v22 = vsel (!%p266_p9), %vm326_vm0, %v3387_v15, 0  ;;  %v607_v24 = vsel (!%p266_p9), %vm326_vm0, %v542_v18, 0  ;;  %v3397_v27 = vld [vmem:[%s5009_s1 + $0x2] sm:$0x3] (!%p266_p9)  ;;  %vm539_vm3 = vcmask (!%p266_p9), 261120  }
  0x11   : > { %3759 = vmatprep.subr.bf16.mxu0 (!%p266_p9), %v4286_v2  ;;  %3765 = vmatprep.subr.bf16.mxu1 (!%p266_p9), %v4286_v2  ;;  %v3406_v29 = vld [vmem:[%s5009_s1 + $0x6] sm:$0x3] (!%p266_p9)  ;;  %v561_v32 = vsel (!%p266_p9), %vm326_vm0, %v3397_v27, 0  ;;  %v3402_v38 = vld [vmem:[%s5009_s1 + $0x4] sm:$0x3] (!%p266_p9)  ;;  %vm2170_vm4 = vcmask (!%p266_p9), 523264  }
  0x12   : > { %v718_v33 = vsel (!%p266_p9), %vm326_vm0, %v3406_v29, 0  ;;  %v772_v41 = vld [vmem:[%s5009_s1] sm:$0x3] (!%p266_p9)  ;;  %v656_v44 = vsel (!%p266_p9), %vm326_vm0, %v3402_v38, 0  ;;  %v3412_v50 = vld [vmem:[%s5009_s1 + $0x2] sm:$0x3] (!%p266_p9) }
  0x13   : > { %v837_v45 = vsel (!%p266_p9), %vm326_vm0, %v772_v41, 0  ;;  %v3421_v51 = vld [vmem:[%s5009_s1 + $0x6] sm:$0x3] (!%p266_p9)  ;;  %v3417_v57 = vld [vmem:[%s5009_s1 + $0x4] sm:$0x3] (!%p266_p9)  ;;  %v791_v59 = vsel (!%p266_p9), %vm326_vm0, %v3412_v50, 0 }
  0x14   : > { %v3427_v58 = vld [vmem:[%s5009_s1 + $0x2] sm:$0x3] (!%p266_p9)  ;;  %v948_v60 = vsel (!%p266_p9), %vm326_vm0, %v3421_v51, 0  ;;  %v1002_v61 = vld [vmem:[%s5009_s1] sm:$0x3] (!%p266_p9)  ;;  %s296_s25 = sand.u32 (!%p266_p9), 1, %s4276_s28  }
  0x15   : > { %s300_s21 = scalar_select %p299_p10, %s4357_s9, 1  ;;  %v3432_v62 = vld [vmem:[%s5009_s1 + $0x4] sm:$0x3]  ;;  %v3436_v1 = vld [vmem:[%s5009_s1 + $0x6] sm:$0x3]  ;;  %vm3297_vm5 = vcmask 130048  }
  0x16   : > { %v3442_v27 = vld [vmem:[%s5009_s1 + $0x2] sm:$0x3]  ;;  %v3451_v29 = vld [vmem:[%s5009_s1 + $0x6] sm:$0x3]  ;;  %v3447_v38 = vld [vmem:[%s5009_s1 + $0x4] sm:$0x3] }
  0x17   : > { %s4131_s24 = smul.u32 72, %s300_s21  ;;  %v1462_v41 = vld [vmem:[%s5009_s1] sm:$0x3]  ;;  %v3466_v50 = vld [vmem:[%s5009_s1 + $0x6] sm:$0x3]  ;;  %s3380_s26 = sshll.u32 %s296_s25, 4 }
  0x18   : > { %s298_s17 = scalar_lea.vmem [#allocation3], %s3380_s26  ;;  %s3605_s19 = sshll.u32 %s4357_s9, 8 }
  0x19   : > { %s4408_s10 = scalar_lea.vmem %s5008_s0, %s4131_s24  ;;  %s3314_s18 = sshll.u32 %s298_s17, 4  ;;  %s4960_s18 = int_to_ptr.vmem [resolvable:$true] %s3314_s18 }
  0x1a   : > { %v305_v7 = vld [vmem:[%s4408_s10] sm:$0xf]  ;;  %v307_v8 = vld [vmem:[%s4408_s10 + $0x4] sm:$0x1]  ;;  %v4176_v10 = vld [vmem:[%s4408_s10 + $0x8] sm:$0x1f]   ;;  %s4965_s22 = scalar_lea.hbm %s5016_s8, %s3605_s19 }
  0x1b   : > { %v3383_v9 = vcombine.low %v305_v7, %v307_v8  ;;  %3756 = vmatmul.mubr.msk.bf16.vlgmr.msra.gmra.mrb[0].mxu1 %vm322_vm2, %v305_v7  ;;  %v477_v13 = vshrl.u32 %v4176_v10, 16  ;;  %v479_v14 = vshll.u32 %v4176_v10, 16  ;;  %v3395_v19 = vld [vmem:[%s4408_s10 + $0x8] sm:$0xf]  ;;  %v3396_v20 = vld [vmem:[%s4408_s10 + $0xc] sm:$0x1] }
  0x1c   : > { %3766 = vmatpush3.bf16.msra.mxu1 %v487_v6  ;;  %3767 = vmatprep.mubr.msk.bf16.mxu1 %vm4287_vm1, %v4286_v2  ;;  %v3398_v25 = vcombine.low %v3395_v19, %v3396_v20  ;;  %v4178_v26 = vld [vmem:[%s4408_s10 + $0x10] sm:$0x1f]   ;;  %v3386_v31 = vld [vmem:[%s4408_s10 + $0x8] sm:$0xf]  ;;  %v4180_v47 = vld [vmem:[%s4408_s10 + $0x18] sm:$0x1f]  }
  0x1d   : > { %v316_v11 = vshrl.u32 %v3383_v9, 16  ;;  %v318_v12 = vshll.u32 %v3383_v9, 16  ;;  %3777 = vmatprep.subr.bf16.mxu1 %v4286_v2  ;;  %v481_v17 = vrot.slane %v479_v14, 1  ;;  %v710_v30 = vshll.u32 %v4178_v26, 16  ;;  %v3410_v42 = vld [vmem:[%s4408_s10 + $0x10] sm:$0xf] }
  0x1e   : > { %v553_v28 = vshll.u32 %v3398_v25, 16  ;;  %v551_v34 = vshrl.u32 %v3398_v25, 16  ;;  %v708_v36 = vshrl.u32 %v4178_v26, 16  ;;  %v3411_v43 = vld [vmem:[%s4408_s10 + $0x14] sm:$0x1]  ;;  %v940_v54 = vshll.u32 %v4180_v47, 16 }
  0x1f   : > { %v320_v16 = vrot.slane %v318_v12, 1  ;;  %v482_v23 = vor.u32 %v481_v17, %v477_v13  ;;  %v712_v37 = vrot.slane %v710_v30, 1  ;;  %v3413_v46 = vcombine.low %v3410_v42, %v3411_v43  ;;  %v3425_v48 = vld [vmem:[%s4408_s10 + $0x18] sm:$0xf]  ;;  %v3426_v49 = vld [vmem:[%s4408_s10 + $0x1c] sm:$0x1] }
  0x20   : > { %v555_v35 = vrot.slane %v553_v28, 1  ;;  %v3428_v52 = vcombine.low %v3425_v48, %v3426_v49  ;;  %v4182_v55 = vld [vmem:[%s4408_s10 + $0x20] sm:$0x1f]   ;;  %v3401_v56 = vld [vmem:[%s4408_s10 + $0x10] sm:$0xf]  ;;  %v938_v4 = vshrl.u32 %v4180_v47, 16 }
  0x21   : > { %v321_v21 = vor.u32 %v320_v16, %v316_v11  ;;  %v713_v40 = vor.u32 %v712_v37, %v708_v36  ;;  %v783_v53 = vshll.u32 %v3413_v46, 16  ;;  %v781_v63 = vshrl.u32 %v3413_v46, 16  ;;  %v3416_v18 = vld [vmem:[%s4408_s10 + $0x18] sm:$0xf]  ;;  %v3440_v20 = vld [vmem:[%s4408_s10 + $0x20] sm:$0xf] }
  0x22   : > { %v556_v39 = vor.u32 %v555_v35, %v551_v34  ;;  %v1013_v0 = vshll.u32 %v3428_v52, 16  ;;  %v942_v5 = vrot.slane %v940_v54, 1  ;;  %v1170_v6 = vshll.u32 %v4182_v55, 16  ;;  %v4184_v26 = vld [vmem:[%s4408_s10 + $0x28] sm:$0x1f]   ;;  %s4967_s9 = scalar_lea.sflag [#allocation4], %s296_s25 }
  0x23   : > { %3750 = vmatmul.mubr.msk.bf16.vlgmr.msra.gmra.mrb[0].mxu0 %vm322_vm2, %v321_v21  ;;  %3768 = vmatmul.mubr.msk.bf16.vlgmr.msra.gmra.mrb[4].mxu1 %vm322_vm2, %v482_v23  ;;  %v785_v3 = vrot.slane %v783_v53, 1  ;;  %v886_v7 = vsel %vm326_vm0, %v3417_v57, 0  ;;  %v1021_v8 = vsel %vm326_vm0, %v3427_v58, 0  ;;  %v1067_v9 = vsel %vm326_vm0, %v1002_v61, 0  ;;  %v3441_v21 = vld [vmem:[%s4408_s10 + $0x24] sm:$0x1] }
  0x24   : > { %3760 = vmatpush3.bf16.msra.mxu0 %v424_v22  ;;  %3761 = vmatprep.mubr.msk.bf16.mxu0 %vm4287_vm1, %v4286_v2  ;;  %v1116_v10 = vsel %vm326_vm0, %v3432_v62, 0  ;;  %v1178_v11 = vsel %vm326_vm0, %v3436_v1, 0  ;;  %v1011_v12 = vshrl.u32 %v3428_v52, 16  ;;  %v1015_v13 = vrot.slane %v1013_v0, 1  ;;  %v3456_v43 = vld [vmem:[%s4408_s10 + $0x2c] sm:$0x1] }
  0x25   : > { %3771 = vmatprep.subr.bf16.mxu0 %v4286_v2  ;;  %3778 = vmatpush3.bf16.msra.mxu1 %v607_v24  ;;  %v786_v14 = vor.u32 %v785_v3, %v781_v63  ;;  %v943_v15 = vor.u32 %v942_v5, %v938_v4  ;;  %v1168_v16 = vshrl.u32 %v4182_v55, 16  ;;  %v1172_v17 = vrot.slane %v1170_v6, 1  ;;  %v4186_v47 = vld [vmem:[%s4408_s10 + $0x30] sm:$0x1f]   ;;  %v3446_v52 = vld [vmem:[%s4408_s10 + $0x28] sm:$0xf] }
  0x26   : > { %3779 = vmatprep.mubr.msk.bf16.mxu1 %vm4287_vm1, %v4286_v2  ;;  %3789 = vmatprep.subr.bf16.mxu1 %v4286_v2  ;;  %v1016_v22 = vor.u32 %v1015_v13, %v1011_v12  ;;  %v3443_v25 = vcombine.low %v3440_v20, %v3441_v21  ;;  %v1400_v30 = vshll.u32 %v4184_v26, 16  ;;  %v1398_v36 = vshrl.u32 %v4184_v26, 16  ;;  %v1692_v62 = vld [vmem:[%s5009_s1] sm:$0x3]  ;;  %v3470_v63 = vld [vmem:[%s4408_s10 + $0x30] sm:$0xf] }
  0x27   : > { %v1173_v23 = vor.u32 %v1172_v17, %v1168_v16  ;;  %v1630_v51 = vshll.u32 %v4186_v47, 16  ;;  %v1638_v54 = vsel %vm326_vm0, %v3466_v50, 0  ;;  %v1628_v57 = vshrl.u32 %v4186_v47, 16  ;;  %v3471_v0 = vld [vmem:[%s4408_s10 + $0x34] sm:$0x1]  ;;  %s4222_s23 = scalar_lea.vmem %s4960_s18, 256 }
  0x28   : > { %v1243_v28 = vshll.u32 %v3443_v25, 16  ;;  %v1241_v34 = vshrl.u32 %v3443_v25, 16  ;;  %v1402_v37 = vrot.slane %v1400_v30, 1  ;;  %v1757_v3 = vsel %vm326_vm0, %v1692_v62, 0  ;;  %v4188_v5 = vld [vmem:[%s4408_s10 + $0x38] sm:$0x1f]   ;;  %p4223_p11 = scmp.ne.s32.totalorder %s4960_s18, %s4222_s23 }
  0x29   : > { %v1632_v58 = vrot.slane %v1630_v51, 1  ;;  %v3473_v4 = vcombine.low %v3470_v63, %v3471_v0  ;;  %v3472_v6 = vld [vmem:[%s5009_s1 + $0x2] sm:$0x3]  ;;  %v3477_v17 = vld [vmem:[%s5009_s1 + $0x4] sm:$0x3]  ;;  %s4288_s24 = smov [#allocation3]  }
  0x2a   : > { %v1245_v35 = vrot.slane %v1243_v28, 1  ;;  %v3485_v21 = vld [vmem:[%s4408_s10 + $0x38] sm:$0xf]  ;;  %v4190_v26 = vld [vmem:[%s4408_s10 + $0x40] sm:$0x1f]   ;;  %p4224_p12 = pnand %p4223_p11, %p4374_p5 }
  0x2b   : > { %3762 = vmatmul.mubr.msk.bf16.vlgmr.msra.gmra.mrb[4].mxu0 %vm322_vm2, %v3386_v31  ;;  %3780 = vmatmul.mubr.msk.bf16.vlgmr.msra.gmra.mrb[8].mxu1 %vm322_vm2, %v3395_v19  ;;  %v1232_v19 = vld [vmem:[%s5009_s1] sm:$0x3]  ;;  %v1633_v61 = vor.u32 %v1632_v58, %v1628_v57  ;;  %v1701_v13 = vshrl.u32 %v3473_v4, 16  ;;  %v2090_v30 = vshll.u32 %v4190_v26, 16 }
  0x2c   : > { %3772 = vmatpush3.bf16.msra.mxu0 %v561_v32  ;;  %3773 = vmatprep.mubr.msk.bf16.mxu0 %vm4287_vm1, %v4286_v2  ;;  %v1297_v24 = vsel %vm326_vm0, %v1232_v19, 0  ;;  %v3431_v31 = vld [vmem:[%s4408_s10 + $0x20] sm:$0xf]  ;;  %v1251_v32 = vsel %vm326_vm0, %v3442_v27, 0  ;;  %p4225_p13 = pneg %p4224_p12 }
  0x2d   : > { %3783 = vmatprep.subr.bf16.mxu0 %v4286_v2  ;;  %3790 = vmatpush3.bf16.msra.mxu1 %v718_v33  ;;  %v1408_v33 = vsel %vm326_vm0, %v3451_v29, 0  ;;  %v3487_v27 = vld [vmem:[%s5009_s1 + $0x2] sm:$0x3]  ;;  %v3496_v29 = vld [vmem:[%s5009_s1 + $0x6] sm:$0x3] }
  0x2e   : > { %3791 = vmatprep.mubr.msk.bf16.mxu1 %vm4287_vm1, %v4286_v2  ;;  %3801 = vmatprep.subr.bf16.mxu1 %v4286_v2 }
  0x33   : > { %3774 = vmatmul.mubr.msk.bf16.vlgmr.msra.gmra.mrb[8].mxu0 %vm322_vm2, %v556_v39  ;;  %3792 = vmatmul.mubr.msk.bf16.vlgmr.msra.gmra.mrb[12].mxu1 %vm322_vm2, %v713_v40  ;;  %v1246_v39 = vor.u32 %v1245_v35, %v1241_v34  ;;  %v1403_v40 = vor.u32 %v1402_v37, %v1398_v36  ;;  %v2088_v36 = vshrl.u32 %v4190_v26, 16  ;;  %v2092_v37 = vrot.slane %v2090_v30, 1 }
  0x34   : > { %3784 = vmatpush3.bf16.msra.mxu0 %v656_v44  ;;  %3785 = vmatprep.mubr.msk.bf16.mxu0 %vm4287_vm1, %v4286_v2  ;;  %v1346_v44 = vsel %vm326_vm0, %v3447_v38, 0  ;;  %v3492_v38 = vld [vmem:[%s5009_s1 + $0x4] sm:$0x3] }
  0x35   : > { %3795 = vmatprep.subr.bf16.mxu0 %v4286_v2  ;;  %3802 = vmatpush3.bf16.msra.mxu1 %v837_v45  ;;  %v1527_v45 = vsel %vm326_vm0, %v1462_v41, 0  ;;  %v2036_v41 = vsel %vm326_vm0, %v3492_v38, 0 }
  0x36   : > { %3803 = vmatprep.mubr.msk.bf16.mxu1 %vm4287_vm1, %v4286_v2  ;;  %3813 = vmatprep.subr.bf16.mxu1 %v4286_v2 }
  0x3b   : > { %3786 = vmatmul.mubr.msk.bf16.vlgmr.msra.gmra.mrb[12].mxu0 %vm322_vm2, %v3401_v56  ;;  %3804 = vmatmul.mubr.msk.bf16.vlgmr.msra.gmra.mrb[16].mxu1 %vm322_vm2, %v3410_v42  ;;  %v3455_v42 = vld [vmem:[%s4408_s10 + $0x28] sm:$0xf] }
  0x3c   : > { %3796 = vmatpush3.bf16.msra.mxu0 %v791_v59  ;;  %3797 = vmatprep.mubr.msk.bf16.mxu0 %vm4287_vm1, %v4286_v2  ;;  %v3458_v46 = vcombine.low %v3455_v42, %v3456_v43  ;;  %v3462_v59 = vld [vmem:[%s5009_s1 + $0x4] sm:$0x3] }
  0x3d   : > { %3807 = vmatprep.subr.bf16.mxu0 %v4286_v2  ;;  %3814 = vmatpush3.bf16.msra.mxu1 %v948_v60  ;;  %v1576_v1 = vsel %vm326_vm0, %v3462_v59, 0 }
  0x3e   : > { %3815 = vmatprep.mubr.msk.bf16.mxu1 %vm4287_vm1, %v4286_v2  ;;  %3825 = vmatprep.subr.bf16.mxu1 %v4286_v2  ;;  %v1473_v49 = vshll.u32 %v3458_v46, 16  ;;  %v1471_v55 = vshrl.u32 %v3458_v46, 16 }
  0x40   : > { %v1475_v56 = vrot.slane %v1473_v49, 1 }
  0x42   : > { %v1476_v60 = vor.u32 %v1475_v56, %v1471_v55 }
  0x43   : > { %3798 = vmatmul.mubr.msk.bf16.vlgmr.msra.gmra.mrb[16].mxu0 %vm322_vm2, %v786_v14  ;;  %3816 = vmatmul.mubr.msk.bf16.vlgmr.msra.gmra.mrb[20].mxu1 %vm322_vm2, %v943_v15  ;;  %v1858_v15 = vshrl.u32 %v4188_v5, 16 }
  0x44   : > { %3808 = vmatpush3.bf16.msra.mxu0 %v886_v7  ;;  %3809 = vmatprep.mubr.msk.bf16.mxu0 %vm4287_vm1, %v4286_v2  ;;  %v1703_v7 = vshll.u32 %v3473_v4, 16 }
  0x45   : > { %3819 = vmatprep.subr.bf16.mxu0 %v4286_v2  ;;  %3826 = vmatpush3.bf16.msra.mxu1 %v1067_v9  ;;  %v1860_v9 = vshll.u32 %v4188_v5, 16 }
  0x46   : > { %3827 = vmatprep.mubr.msk.bf16.mxu1 %vm4287_vm1, %v4286_v2  ;;  %3837 = vmatprep.subr.bf16.mxu1 %v4286_v2  ;;  %v1705_v14 = vrot.slane %v1703_v7, 1 }
  0x47   : > { %v1862_v16 = vrot.slane %v1860_v9, 1 }
  0x49   : > { %v1863_v19 = vor.u32 %v1862_v16, %v1858_v15 }
  0x4b   : > { %3810 = vmatmul.mubr.msk.bf16.vlgmr.msra.gmra.mrb[20].mxu0 %vm322_vm2, %v3416_v18  ;;  %3828 = vmatmul.mubr.msk.bf16.vlgmr.msra.gmra.mrb[24].mxu1 %vm322_vm2, %v3425_v48  ;;  %v3457_v48 = vld [vmem:[%s5009_s1 + $0x2] sm:$0x3]  ;;  %v1706_v18 = vor.u32 %v1705_v14, %v1701_v13 }
  0x4c   : > { %3820 = vmatpush3.bf16.msra.mxu0 %v1021_v8  ;;  %3821 = vmatprep.mubr.msk.bf16.mxu0 %vm4287_vm1, %v4286_v2  ;;  %v1481_v53 = vsel %vm326_vm0, %v3457_v48, 0  ;;  %v3481_v8 = vld [vmem:[%s5009_s1 + $0x6] sm:$0x3] }
  0x4d   : > { %3831 = vmatprep.subr.bf16.mxu0 %v4286_v2  ;;  %3838 = vmatpush3.bf16.msra.mxu1 %v1178_v11  ;;  %v1711_v11 = vsel %vm326_vm0, %v3472_v6, 0  ;;  %v1868_v12 = vsel %vm326_vm0, %v3481_v8, 0 }
  0x4e   : > { %3839 = vmatprep.mubr.msk.bf16.mxu1 %vm4287_vm1, %v4286_v2  ;;  %3849 = vmatprep.subr.bf16.mxu1 %v4286_v2 }
  0x53   : > { %3822 = vmatmul.mubr.msk.bf16.vlgmr.msra.gmra.mrb[24].mxu0 %vm322_vm2, %v1016_v22  ;;  %3840 = vmatmul.mubr.msk.bf16.vlgmr.msra.gmra.mrb[28].mxu1 %vm322_vm2, %v1173_v23  ;;  %v3486_v22 = vld [vmem:[%s4408_s10 + $0x3c] sm:$0x1]  ;;  %v1806_v23 = vsel %vm326_vm0, %v3477_v17, 0 }
  0x54   : > { %3832 = vmatpush3.bf16.msra.mxu0 %v1116_v10  ;;  %3833 = vmatprep.mubr.msk.bf16.mxu0 %vm4287_vm1, %v4286_v2  ;;  %v3461_v10 = vld [vmem:[%s4408_s10 + $0x30] sm:$0xf]  ;;  %v3488_v25 = vcombine.low %v3485_v21, %v3486_v22 }
  0x55   : > { %3843 = vmatprep.subr.bf16.mxu0 %v4286_v2  ;;  %3850 = vmatpush3.bf16.msra.mxu1 %v1297_v24 }
  0x56   : > { %3851 = vmatprep.mubr.msk.bf16.mxu1 %vm4287_vm1, %v4286_v2  ;;  %3861 = vmatprep.subr.bf16.mxu1 %v4286_v2  ;;  %v1933_v28 = vshll.u32 %v3488_v25, 16  ;;  %v1931_v34 = vshrl.u32 %v3488_v25, 16 }
  0x58   : > { %v1935_v35 = vrot.slane %v1933_v28, 1 }
  0x5b   : > { %3834 = vmatmul.mubr.msk.bf16.vlgmr.msra.gmra.mrb[28].mxu0 %vm322_vm2, %v3431_v31  ;;  %3852 = vmatmul.mubr.msk.bf16.vlgmr.msra.gmra.mrb[32].mxu1 %vm322_vm2, %v3440_v20  ;;  %v1922_v20 = vld [vmem:[%s5009_s1] sm:$0x3]  ;;  %v3476_v31 = vld [vmem:[%s4408_s10 + $0x38] sm:$0xf] }
  0x5c   : > { %3844 = vmatpush3.bf16.msra.mxu0 %v1251_v32  ;;  %3845 = vmatprep.mubr.msk.bf16.mxu0 %vm4287_vm1, %v4286_v2  ;;  %v1987_v24 = vsel %vm326_vm0, %v1922_v20, 0  ;;  %v1941_v32 = vsel %vm326_vm0, %v3487_v27, 0 }
  0x5d   : > { %3855 = vmatprep.subr.bf16.mxu0 %v4286_v2  ;;  %3862 = vmatpush3.bf16.msra.mxu1 %v1408_v33  ;;  %v2098_v33 = vsel %vm326_vm0, %v3496_v29, 0 }
  0x5e   : > { %3863 = vmatprep.mubr.msk.bf16.mxu1 %vm4287_vm1, %v4286_v2  ;;  %3873 = vmatprep.subr.bf16.mxu1 %v4286_v2 }
  0x63   : > { %3846 = vmatmul.mubr.msk.bf16.vlgmr.msra.gmra.mrb[32].mxu0 %vm322_vm2, %v1246_v39  ;;  %3864 = vmatmul.mubr.msk.bf16.vlgmr.msra.gmra.mrb[36].mxu1 %vm322_vm2, %v1403_v40  ;;  %v1936_v39 = vor.u32 %v1935_v35, %v1931_v34  ;;  %v2093_v40 = vor.u32 %v2092_v37, %v2088_v36 }
  0x64   : > { %3856 = vmatpush3.bf16.msra.mxu0 %v1346_v44  ;;  %3857 = vmatprep.mubr.msk.bf16.mxu0 %vm4287_vm1, %v4286_v2 }
  0x65   : > { %3867 = vmatprep.subr.bf16.mxu0 %v4286_v2  ;;  %3874 = vmatpush3.bf16.msra.mxu1 %v1527_v45 }
  0x66   : > { %3875 = vmatprep.mubr.msk.bf16.mxu1 %vm4287_vm1, %v4286_v2  ;;  %3885 = vmatprep.subr.bf16.mxu1 %v4286_v2 }
  0x6b   : > { %3858 = vmatmul.mubr.msk.bf16.vlgmr.msra.gmra.mrb[36].mxu0 %vm322_vm2, %v3446_v52  ;;  %3876 = vmatmul.mubr.msk.bf16.vlgmr.msra.gmra.mrb[40].mxu1 %vm322_vm2, %v3455_v42  ;;  %v3491_v42 = vld [vmem:[%s4408_s10 + $0x40] sm:$0xf]  ;;  %s4226_s10 = sshll.u32 %s4288_s24, 4  ;;  %s4227_s10 = int_to_ptr.vmem [resolvable:$false] %s4226_s10 }
  0x6c   : > { %3868 = vmatpush3.bf16.msra.mxu0 %v1481_v53  ;;  %3869 = vmatprep.mubr.msk.bf16.mxu0 %vm4287_vm1, %v4286_v2  ;;  %s4228_s26 = scalar_lea.vmem %s4227_s10, 512  ;;  %p4229_p0 = scmp.lt.s32.totalorder %s4960_s18, %s4227_s10 }
  0x6d   : > { %3879 = vmatprep.subr.bf16.mxu0 %v4286_v2  ;;  %3886 = vmatpush3.bf16.msra.mxu1 %v1638_v54  ;;  %p4230_p1 = scmp.lt.s32.totalorder %s4228_s26, %s4222_s23 }
  0x6e   : > { %3887 = vmatprep.mubr.msk.bf16.mxu1 %vm4287_vm1, %v4286_v2  ;;  %3897 = vmatprep.subr.bf16.mxu1 %v4286_v2 }
  0x6f   : > { %p4231_p2 = por %p4230_p1, %p4229_p0 }
  0x71   : > { %p4232_p3 = pnand %p4231_p2, %p4225_p13 }
  0x73   : > { %3870 = vmatmul.mubr.msk.bf16.vlgmr.msra.gmra.mrb[40].mxu0 %vm322_vm2, %v1476_v60  ;;  %3888 = vmatmul.mubr.msk.bf16.vlgmr.msra.gmra.mrb[44].mxu1 %vm322_vm2, %v1633_v61  ;;  %v4688_v61 = vld [vmem:[%s5010_s2] ss:$0 sm:$0xff] }
  0x74   : > { %3880 = vmatpush3.bf16.msra.mxu0 %v1576_v1  ;;  %3881 = vmatprep.mubr.msk.bf16.mxu0 %vm4287_vm1, %v4286_v2 }
  0x75   : > { %3891 = vmatprep.subr.bf16.mxu0 %v4286_v2  ;;  %3898 = vmatpush3.bf16.msra.mxu1 %v1757_v3 }
  0x76   : > { %3899 = vmatprep.mubr.msk.bf16.mxu1 %vm4287_vm1, %v4286_v2  ;;  %3909 = vmatprep.subr.bf16.mxu1 %v4286_v2 }
  0x7b   : > { %3882 = vmatmul.mubr.msk.bf16.vlgmr.msra.gmra.mrb[44].mxu0 %vm322_vm2, %v3461_v10  ;;  %3900 = vmatmul.mubr.msk.bf16.vlgmr.msra.gmra.mrb[48].mxu1 %vm322_vm2, %v3470_v63 }
  0x7c   : > { %3892 = vmatpush3.bf16.msra.mxu0 %v1711_v11  ;;  %3893 = vmatprep.mubr.msk.bf16.mxu0 %vm4287_vm1, %v4286_v2 }
  0x7d   : > { %3903 = vmatprep.subr.bf16.mxu0 %v4286_v2  ;;  %3910 = vmatpush3.bf16.msra.mxu1 %v1868_v12 }
  0x7e   : > { %3911 = vmatprep.mubr.msk.bf16.mxu1 %vm4287_vm1, %v4286_v2  ;;  %3921 = vmatprep.subr.bf16.mxu1 %v4286_v2 }
  0x83   : > { %3894 = vmatmul.mubr.msk.bf16.vlgmr.msra.gmra.mrb[48].mxu0 %vm322_vm2, %v1706_v18  ;;  %3912 = vmatmul.mubr.msk.bf16.vlgmr.msra.gmra.mrb[52].mxu1 %vm322_vm2, %v1863_v19 }
  0x84   : > { %3904 = vmatpush3.bf16.msra.mxu0 %v1806_v23  ;;  %3905 = vmatprep.mubr.msk.bf16.mxu0 %vm4287_vm1, %v4286_v2 }
  0x85   : > { %3915 = vmatprep.subr.bf16.mxu0 %v4286_v2  ;;  %3922 = vmatpush3.bf16.msra.mxu1 %v1987_v24 }
  0x86   : > { %3923 = vmatprep.mubr.msk.bf16.mxu1 %vm4287_vm1, %v4286_v2  ;;  %3933 = vmatprep.subr.bf16.mxu1 %v4286_v2 }
  0x8b   : > { %3906 = vmatmul.mubr.msk.bf16.vlgmr.msra.gmra.mrb[52].mxu0 %vm322_vm2, %v3476_v31  ;;  %3924 = vmatmul.mubr.msk.bf16.vlgmr.msra.gmra.mrb[56].mxu1 %vm322_vm2, %v3485_v21 }
  0x8c   : > { %3916 = vmatpush3.bf16.msra.mxu0 %v1941_v32  ;;  %3917 = vmatprep.mubr.msk.bf16.mxu0 %vm4287_vm1, %v4286_v2 }
  0x8d   : > { %3927 = vmatprep.subr.bf16.mxu0 %v4286_v2  ;;  %3934 = vmatpush3.bf16.msra.mxu1 %v2098_v33 }
  0x8e   : > { %3935 = vmatprep.mubr.msk.bf16.mxu1 %vm4287_vm1, %v4286_v2  ;;  %3951 = vmatprep.subr.bf16.mxu1 %v4286_v2 }
  0x93   : > { %3918 = vmatmul.mubr.msk.bf16.vlgmr.msra.gmra.mrb[56].mxu0 %vm322_vm2, %v1936_v39  ;;  %3936 = vmatmul.mubr.msk.bf16.vlgmr.msra.gmra.mrb[60].mxu1 %vm322_vm2, %v2093_v40 }
  0x94   : > { %3928 = vmatpush3.bf16.msra.mxu0 %v2036_v41  ;;  %3929 = vmatprep.mubr.msk.bf16.mxu0 %vm4287_vm1, %v4286_v2 }
  0x95   : > { %3939 = vmatprep.subr.bf16.mxu0 %v4286_v2  ;;  %3959 = vmatprep.mubr.msk.bf16.mxu1 %vm4287_vm1, %v4286_v2 }
  0x9b   : > { %3930 = vmatmul.mubr.msk.bf16.vlgmr.msra.gmra.mrb[60].mxu0 %vm322_vm2, %v3491_v42 }
  0x9c   : > { %3947 = vmatprep.mubr.msk.bf16.mxu0 %vm4287_vm1, %v4286_v2 }
  0xee   : > { %v410_v43 = vpop.f32.mrb[0].mxu1 }
  0xef   : > { %v3757_v44 = vpop.f32.mrb[1].mxu1 }
  0xf0   : > { %v413_v45 = vpop.f32.mrb[2].mxu1 }
  0xf1   : > { %v3758_v46 = vpop.f32.mrb[3].mxu1 }
  0xf6   : > { %v364_v47 = vpop.f32.mrb[0].mxu0  ;;  %v523_v48 = vpop.f32.mrb[4].mxu1 }
  0xf7   : > { %v411_v49 = vadd.f32 %v410_v43, %v364_v47  ;;  %v3751_v50 = vpop.f32.mrb[1].mxu0  ;;  %v3769_v51 = vpop.f32.mrb[5].mxu1 }
  0xf8   : > { %v367_v52 = vpop.f32.mrb[2].mxu0  ;;  %v526_v53 = vpop.f32.mrb[6].mxu1 }
  0xf9   : > { %v3752_v54 = vpop.f32.mrb[3].mxu0  ;;  %v3770_v55 = vpop.f32.mrb[7].mxu1 }
  0xfe   : > { %v460_v56 = vpop.f32.mrb[4].mxu0  ;;  %v643_v57 = vpop.f32.mrb[8].mxu1 }
  0xff   : > { %v466_v58 = vadd.f32 %v460_v56, %v411_v49  ;;  %v3763_v59 = vpop.f32.mrb[5].mxu0  ;;  %v3781_v60 = vpop.f32.mrb[9].mxu1 }
 0x100   : > { %v463_v62 = vpop.f32.mrb[6].mxu0  ;;  %v646_v63 = vpop.f32.mrb[10].mxu1 }
 0x101   : > { %v529_v0 = vadd.f32 %v523_v48, %v466_v58  ;;  %v3764_v1 = vpop.f32.mrb[7].mxu0  ;;  %v3782_v3 = vpop.f32.mrb[11].mxu1 }
 0x103   : > { %v537_v4 = vadd.f32 %v4688_v61, %v529_v0 }
 0x105   : > { %v538_v5 = vmax.f32 %v537_v4, 0.0 }
 0x106   : > { %v597_v6 = vpop.f32.mrb[8].mxu0  ;;  %v754_v7 = vpop.f32.mrb[12].mxu1 }
 0x107   : > { %540 = vst.msk [vmem:[#allocation2] sm:$0xff] %vm539_vm3, %v538_v5  ;;  %v644_v8 = vadd.f32 %v643_v57, %v597_v6  ;;  %v3775_v9 = vpop.f32.mrb[9].mxu0  ;;  %v3793_v10 = vpop.f32.mrb[13].mxu1 }
 0x108   : > { %v600_v11 = vpop.f32.mrb[10].mxu0  ;;  %v757_v12 = vpop.f32.mrb[14].mxu1 }
 0x109   : > { %v3776_v13 = vpop.f32.mrb[11].mxu0  ;;  %v3794_v14 = vpop.f32.mrb[15].mxu1 }
 0x10e   : > { %v692_v15 = vpop.f32.mrb[12].mxu0  ;;  %v873_v16 = vpop.f32.mrb[16].mxu1  ;;  %v2151_v36 = vld [vmem:[#allocation2] sm:$0xff] }
 0x10f   : > { %v698_v17 = vadd.f32 %v692_v15, %v644_v8  ;;  %v3787_v18 = vpop.f32.mrb[13].mxu0  ;;  %v3805_v19 = vpop.f32.mrb[17].mxu1 }
 0x110   : > { %v695_v20 = vpop.f32.mrb[14].mxu0  ;;  %v876_v21 = vpop.f32.mrb[18].mxu1 }
 0x111   : > { %v760_v22 = vadd.f32 %v754_v7, %v698_v17  ;;  %v3788_v23 = vpop.f32.mrb[15].mxu0  ;;  %v3806_v24 = vpop.f32.mrb[19].mxu1 }
 0x113   : > { %v768_v25 = vadd.f32 %v4688_v61, %v760_v22 }
 0x115   : > { %v769_v26 = vmax.f32 %v768_v25, 0.0 }
 0x116   : > { %v827_v27 = vpop.f32.mrb[16].mxu0  ;;  %v984_v28 = vpop.f32.mrb[20].mxu1 }
 0x117   : > { %770 = vst.msk [vmem:[#allocation2 + $0x8] sm:$0xff] %vm539_vm3, %v769_v26  ;;  %v874_v29 = vadd.f32 %v873_v16, %v827_v27  ;;  %v3799_v30 = vpop.f32.mrb[17].mxu0  ;;  %v3817_v31 = vpop.f32.mrb[21].mxu1 }
 0x118   : > { %v830_v32 = vpop.f32.mrb[18].mxu0  ;;  %v987_v33 = vpop.f32.mrb[22].mxu1 }
 0x119   : > { %v3800_v34 = vpop.f32.mrb[19].mxu0  ;;  %v3818_v35 = vpop.f32.mrb[23].mxu1 }
 0x11e   : > { %v2152_v37 = vld [vmem:[#allocation2 + $0x8] sm:$0xff]  ;;  %v922_v38 = vpop.f32.mrb[20].mxu0  ;;  %v1103_v39 = vpop.f32.mrb[24].mxu1 }
 0x11f   : > { %v928_v40 = vadd.f32 %v922_v38, %v874_v29  ;;  %v3811_v41 = vpop.f32.mrb[21].mxu0  ;;  %v4694_v42 = vpack.c.bf16 %v2152_v37, %v2151_v36  ;;  %v3829_v43 = vpop.f32.mrb[25].mxu1 }
 0x120   : > { %v925_v44 = vpop.f32.mrb[22].mxu0  ;;  %v1106_v45 = vpop.f32.mrb[26].mxu1 }
 0x121   : > { %v990_v46 = vadd.f32 %v984_v28, %v928_v40  ;;  %v3812_v47 = vpop.f32.mrb[23].mxu0  ;;  %3940 = vmatpush3.bf16.msra.mxu0 %v4694_v42  ;;  %3952 = vmatpush3.bf16.msra.mxu1 %v4694_v42  ;;  %v3830_v48 = vpop.f32.mrb[27].mxu1 }
 0x122   : > { %3941 = vmatprep.subr.bf16.mxu0 %v4286_v2  ;;  %3953 = vmatprep.subr.bf16.mxu1 %v4286_v2 }
 0x123   : > { %v998_v49 = vadd.f32 %v4688_v61, %v990_v46 }
 0x125   : > { %v999_v50 = vmax.f32 %v998_v49, 0.0 }
 0x126   : > { %v1057_v51 = vpop.f32.mrb[24].mxu0  ;;  %v1214_v52 = vpop.f32.mrb[28].mxu1 }
 0x127   : > { %1000 = vst.msk [vmem:[#allocation2 + $0x10] sm:$0xff] %vm539_vm3, %v999_v50  ;;  %v1104_v53 = vadd.f32 %v1103_v39, %v1057_v51  ;;  %v3823_v54 = vpop.f32.mrb[25].mxu0  ;;  %v3841_v55 = vpop.f32.mrb[29].mxu1 }
 0x128   : > { %v1060_v56 = vpop.f32.mrb[26].mxu0  ;;  %v1217_v57 = vpop.f32.mrb[30].mxu1 }
 0x129   : > { %v3824_v58 = vpop.f32.mrb[27].mxu0  ;;  %v3842_v59 = vpop.f32.mrb[31].mxu1 }
 0x12e   : > { %v1152_v60 = vpop.f32.mrb[28].mxu0  ;;  %v1333_v62 = vpop.f32.mrb[32].mxu1  ;;  %v2153_v19 = vld [vmem:[#allocation2 + $0x10] sm:$0xff] }
 0x12f   : > { %v1158_v63 = vadd.f32 %v1152_v60, %v1104_v53  ;;  %v3835_v0 = vpop.f32.mrb[29].mxu0  ;;  %v3853_v1 = vpop.f32.mrb[33].mxu1 }
 0x130   : > { %v1155_v3 = vpop.f32.mrb[30].mxu0  ;;  %v1336_v4 = vpop.f32.mrb[34].mxu1 }
 0x131   : > { %v1220_v5 = vadd.f32 %v1214_v52, %v1158_v63  ;;  %v3836_v6 = vpop.f32.mrb[31].mxu0  ;;  %v3854_v7 = vpop.f32.mrb[35].mxu1 }
 0x133   : > { %v1228_v8 = vadd.f32 %v4688_v61, %v1220_v5 }
 0x135   : > { %v1229_v9 = vmax.f32 %v1228_v8, 0.0 }
 0x136   : > { %v1287_v10 = vpop.f32.mrb[32].mxu0  ;;  %v1444_v11 = vpop.f32.mrb[36].mxu1 }
 0x137   : > { %1230 = vst.msk [vmem:[#allocation2 + $0x18] sm:$0xff] %vm539_vm3, %v1229_v9  ;;  %v1334_v12 = vadd.f32 %v1333_v62, %v1287_v10  ;;  %v3847_v13 = vpop.f32.mrb[33].mxu0  ;;  %v3865_v14 = vpop.f32.mrb[37].mxu1 }
 0x138   : > { %v1290_v15 = vpop.f32.mrb[34].mxu0  ;;  %v1447_v16 = vpop.f32.mrb[38].mxu1 }
 0x139   : > { %v3848_v17 = vpop.f32.mrb[35].mxu0  ;;  %v3866_v18 = vpop.f32.mrb[39].mxu1 }
 0x13e   : > { %v2154_v20 = vld [vmem:[#allocation2 + $0x18] sm:$0xff]  ;;  %v1382_v21 = vpop.f32.mrb[36].mxu0  ;;  %v1563_v22 = vpop.f32.mrb[40].mxu1 }
 0x13f   : > { %v1388_v23 = vadd.f32 %v1382_v21, %v1334_v12  ;;  %v3859_v24 = vpop.f32.mrb[37].mxu0  ;;  %v4704_v25 = vpack.c.bf16 %v2154_v20, %v2153_v19  ;;  %v3877_v26 = vpop.f32.mrb[41].mxu1 }
 0x140   : > { %v1385_v27 = vpop.f32.mrb[38].mxu0  ;;  %v1566_v28 = vpop.f32.mrb[42].mxu1 }
 0x141   : > { %v1450_v29 = vadd.f32 %v1444_v11, %v1388_v23  ;;  %v3860_v30 = vpop.f32.mrb[39].mxu0  ;;  %3942 = vmatpush3.bf16.msra.mxu0 %v4704_v25  ;;  %3954 = vmatpush3.bf16.msra.mxu1 %v4704_v25  ;;  %v3878_v31 = vpop.f32.mrb[43].mxu1 }
 0x142   : > { %3943 = vmatprep.subr.bf16.mxu0 %v4286_v2  ;;  %3955 = vmatprep.subr.bf16.mxu1 %v4286_v2 }
 0x143   : > { %v1458_v32 = vadd.f32 %v4688_v61, %v1450_v29 }
 0x145   : > { %v1459_v33 = vmax.f32 %v1458_v32, 0.0 }
 0x146   : > { %v1517_v34 = vpop.f32.mrb[40].mxu0  ;;  %v1674_v35 = vpop.f32.mrb[44].mxu1 }
 0x147   : > { %1460 = vst.msk [vmem:[#allocation2 + $0x20] sm:$0xff] %vm539_vm3, %v1459_v33  ;;  %v1564_v36 = vadd.f32 %v1563_v22, %v1517_v34  ;;  %v3871_v37 = vpop.f32.mrb[41].mxu0  ;;  %v3889_v38 = vpop.f32.mrb[45].mxu1 }
 0x148   : > { %v1520_v39 = vpop.f32.mrb[42].mxu0  ;;  %v1677_v40 = vpop.f32.mrb[46].mxu1 }
 0x149   : > { %v3872_v41 = vpop.f32.mrb[43].mxu0  ;;  %v3890_v43 = vpop.f32.mrb[47].mxu1  ;;  %v4191_v39 = vld [vmem:[%s5011_s3] sm:$0xff]   ;;  %v4192_v40 = vld [vmem:[%s5011_s3 + $0x8] sm:$0xff]  }
 0x14a   : > { %v4194_v41 = vld [vmem:[%s5012_s4] sm:$0xff]   ;;  %v4195_v43 = vld [vmem:[%s5012_s4 + $0x18] sm:$0xff]  }
 0x14e   : > { %v1612_v44 = vpop.f32.mrb[44].mxu0  ;;  %v1793_v45 = vpop.f32.mrb[48].mxu1  ;;  %v2155_v3 = vld [vmem:[#allocation2 + $0x20] sm:$0xff] }
 0x14f   : > { %v1618_v46 = vadd.f32 %v1612_v44, %v1564_v36  ;;  %v3883_v47 = vpop.f32.mrb[45].mxu0  ;;  %v3901_v48 = vpop.f32.mrb[49].mxu1  ;;  %v4196_v44 = vld [vmem:[%s5012_s4 + $0x8] sm:$0xff]  }
 0x150   : > { %v1615_v49 = vpop.f32.mrb[46].mxu0  ;;  %v1796_v50 = vpop.f32.mrb[50].mxu1 }
 0x151   : > { %v1680_v51 = vadd.f32 %v1674_v35, %v1618_v46  ;;  %v3884_v52 = vpop.f32.mrb[47].mxu0  ;;  %v3902_v53 = vpop.f32.mrb[51].mxu1 }
 0x153   : > { %v1688_v54 = vadd.f32 %v4688_v61, %v1680_v51 }
 0x155   : > { %v1689_v55 = vmax.f32 %v1688_v54, 0.0 }
 0x156   : > { %v1747_v56 = vpop.f32.mrb[48].mxu0  ;;  %v1904_v57 = vpop.f32.mrb[52].mxu1 }
 0x157   : > { %1690 = vst.msk [vmem:[#allocation2 + $0x28] sm:$0xff] %vm539_vm3, %v1689_v55  ;;  %v1794_v58 = vadd.f32 %v1793_v45, %v1747_v56  ;;  %v3895_v59 = vpop.f32.mrb[49].mxu0  ;;  %v3913_v60 = vpop.f32.mrb[53].mxu1  ;;  %v4197_v55 = vld [vmem:[%s5011_s3 + $0x10] sm:$0xff]   ;;  %v4198_v56 = vld [vmem:[%s5012_s4 + $0x20] sm:$0xff]  }
 0x158   : > { %v1750_v62 = vpop.f32.mrb[50].mxu0  ;;  %v1907_v63 = vpop.f32.mrb[54].mxu1 }
 0x159   : > { %v3896_v0 = vpop.f32.mrb[51].mxu0  ;;  %v3914_v1 = vpop.f32.mrb[55].mxu1 }
 0x15e   : > { %v2156_v4 = vld [vmem:[#allocation2 + $0x28] sm:$0xff]  ;;  %v1842_v5 = vpop.f32.mrb[52].mxu0  ;;  %v2023_v6 = vpop.f32.mrb[56].mxu1 }
 0x15f   : > { %v1848_v7 = vadd.f32 %v1842_v5, %v1794_v58  ;;  %v3907_v8 = vpop.f32.mrb[53].mxu0  ;;  %v4714_v9 = vpack.c.bf16 %v2156_v4, %v2155_v3  ;;  %v3925_v10 = vpop.f32.mrb[57].mxu1 }
 0x160   : > { %v1845_v11 = vpop.f32.mrb[54].mxu0  ;;  %v2026_v12 = vpop.f32.mrb[58].mxu1 }
 0x161   : > { %v1910_v13 = vadd.f32 %v1904_v57, %v1848_v7  ;;  %v3908_v14 = vpop.f32.mrb[55].mxu0  ;;  %3944 = vmatpush3.bf16.msra.mxu0 %v4714_v9  ;;  %3956 = vmatpush3.bf16.msra.mxu1 %v4714_v9  ;;  %v3926_v15 = vpop.f32.mrb[59].mxu1  ;;  %v4199_v57 = vld [vmem:[%s5012_s4 + $0x28] sm:$0xff]   ;;  %v4200_v12 = vld [vmem:[%s5011_s3 + $0x18] sm:$0xff]  }
 0x162   : > { %3945 = vmatprep.subr.bf16.mxu0 %v4286_v2  ;;  %3957 = vmatprep.subr.bf16.mxu1 %v4286_v2  ;;  %v4202_v14 = vld [vmem:[%s5012_s4 + $0x38] sm:$0xff]  }
 0x163   : > { %v1918_v16 = vadd.f32 %v4688_v61, %v1910_v13  ;;  %v4201_v13 = vld [vmem:[%s5012_s4 + $0x30] sm:$0xff]  }
 0x165   : > { %v1919_v17 = vmax.f32 %v1918_v16, 0.0 }
 0x166   : > { %v1977_v18 = vpop.f32.mrb[56].mxu0  ;;  %v2134_v19 = vpop.f32.mrb[60].mxu1 }
 0x167   : > { %1920 = vst.msk [vmem:[#allocation2 + $0x30] sm:$0xff] %vm539_vm3, %v1919_v17  ;;  %v2024_v20 = vadd.f32 %v2023_v6, %v1977_v18  ;;  %v3919_v21 = vpop.f32.mrb[57].mxu0  ;;  %v3937_v22 = vpop.f32.mrb[61].mxu1 }
 0x168   : > { %v1980_v23 = vpop.f32.mrb[58].mxu0  ;;  %v2137_v24 = vpop.f32.mrb[62].mxu1 }
 0x169   : > { %v3920_v26 = vpop.f32.mrb[59].mxu0  ;;  %v3938_v27 = vpop.f32.mrb[63].mxu1 }
 0x16a   : > { %v4203_v27 = vld [vmem:[%s5011_s3 + $0x20] sm:$0xff]  }
 0x16e   : > { %v2072_v28 = vpop.f32.mrb[60].mxu0  ;;  %v2157_v36 = vld [vmem:[#allocation2 + $0x30] sm:$0xff] }
 0x16f   : > { %v2078_v29 = vadd.f32 %v2072_v28, %v2024_v20  ;;  %v3931_v30 = vpop.f32.mrb[61].mxu0  ;;  %v4204_v28 = vld [vmem:[%s5012_s4 + $0x40] sm:$0xff]  }
 0x170   : > { %v2075_v31 = vpop.f32.mrb[62].mxu0 }
 0x171   : > { %v2140_v32 = vadd.f32 %v2134_v19, %v2078_v29  ;;  %v3932_v33 = vpop.f32.mrb[63].mxu0  ;;  %v4205_v29 = vld [vmem:[%s5012_s4 + $0x48] sm:$0xff]  }
 0x173   : > { %v2148_v34 = vadd.f32 %v4688_v61, %v2140_v32  ;;  %v4193_v61 = vld [vmem:[%s5012_s4 + $0x10] sm:$0xff]  }
 0x175   : > { %v2149_v35 = vmax.f32 %v2148_v34, 0.0 }
 0x177   : > { %2150 = vst.msk [vmem:[#allocation2 + $0x38] sm:$0xff] %vm539_vm3, %v2149_v35 }
 0x17e   : > { %v2158_v37 = vld [vmem:[#allocation2 + $0x38] sm:$0xff] }
 0x17f   : > { %v4724_v38 = vpack.c.bf16 %v2158_v37, %v2157_v36 }
 0x181   : > { %3946 = vmatpush3.bf16.msra.mxu0 %v4724_v38  ;;  %3958 = vmatpush3.bf16.msra.mxu1 %v4724_v38 }
 0x182   : > { %3963 = vmatprep.subr.bf16.mxu0 %v4286_v2  ;;  %3971 = vmatprep.subr.bf16.mxu1 %v4286_v2 }
 0x184   : > { %3948 = vmatmul.mubr.msk.bf16.vlgmr.msra.gmra.mrb[64].mxu0 %vm2170_vm4, %v4191_v39  ;;  %3960 = vmatmul.mubr.msk.bf16.vlgmr.msra.gmra.mrb[64].mxu1 %vm2170_vm4, %v4192_v40 }
 0x185   : > { %3964 = vmatpush3.bf16.msra.mxu0 %v4193_v61  ;;  %3972 = vmatpush3.bf16.msra.mxu1 %v4194_v41  ;;  %v4206_v41 = vld [vmem:[%s5011_s3 + $0x28] sm:$0xff]  }
 0x186   : > { %3965 = vmatprep.subr.bf16.mxu0 %v4286_v2  ;;  %3973 = vmatprep.subr.bf16.mxu1 %v4286_v2 }
 0x187   : > { %3967 = vmatprep.mubr.msk.bf16.mxu0 %vm4287_vm1, %v4286_v2  ;;  %3975 = vmatprep.mubr.msk.bf16.mxu1 %vm4287_vm1, %v4286_v2 }
 0x189   : > { %3966 = vmatpush3.bf16.msra.mxu0 %v4195_v43  ;;  %3974 = vmatpush3.bf16.msra.mxu1 %v4196_v44  ;;  %v4207_v43 = vld [vmem:[%s5012_s4 + $0x50] sm:$0xff]   ;;  %v4208_v44 = vld [vmem:[%s5012_s4 + $0x58] sm:$0xff]  }
 0x18a   : > { %3979 = vmatprep.subr.bf16.mxu0 %v4286_v2  ;;  %3991 = vmatprep.subr.bf16.mxu1 %v4286_v2 }
 0x257   : > { %v2208_v45 = vpop.f32.mrb[64].mxu0  ;;  %v2265_v46 = vpop.f32.mrb[64].mxu1 }
 0x258   : > { %v3949_v47 = vpop.f32.mrb[65].mxu0  ;;  %v3961_v48 = vpop.f32.mrb[65].mxu1 }
 0x259   : > { %v2211_v49 = vpop.f32.mrb[66].mxu0  ;;  %v2268_v50 = vpop.f32.mrb[66].mxu1 }
 0x25a   : > { %v2215_v51 = vpack.c.bf16 %v2211_v49, %v2208_v45  ;;  %v2272_v52 = vpack.c.bf16 %v2268_v50, %v2265_v46  ;;  %v3962_v53 = vpop.f32.mrb[67].mxu1  ;;  %v3950_v54 = vpop.f32.mrb[67].mxu0 }
 0x25c   : > { %3968 = vmatmul.mubr.msk.bf16.vlgmr.msra.gmra.mrb[68].mxu0 %vm539_vm3, %v2272_v52  ;;  %3976 = vmatmul.mubr.msk.bf16.vlgmr.msra.gmra.mrb[68].mxu1 %vm539_vm3, %v2215_v51 }
 0x25d   : > { %3980 = vmatpush3.bf16.msra.mxu0 %v4694_v42  ;;  %3987 = vmatprep.mubr.msk.bf16.mxu0 %vm4287_vm1, %v4286_v2 }
 0x25e   : > { %3981 = vmatprep.subr.bf16.mxu0 %v4286_v2  ;;  %3995 = vmatprep.mubr.msk.bf16.mxu1 %vm4287_vm1, %v4286_v2 }
 0x25f   : > { %3992 = vmatpush3.bf16.msra.mxu1 %v4198_v56  ;;  %v4209_v56 = vld [vmem:[%s5011_s3 + $0x30] sm:$0xff]  }
 0x260   : > { %3993 = vmatprep.subr.bf16.mxu1 %v4286_v2 }
 0x261   : > { %3982 = vmatpush3.bf16.msra.mxu0 %v4704_v25 }
 0x262   : > { %3983 = vmatprep.subr.bf16.mxu0 %v4286_v2 }
 0x263   : > { %3994 = vmatpush3.bf16.msra.mxu1 %v4199_v57  ;;  %v4210_v57 = vld [vmem:[%s5012_s4 + $0x60] sm:$0xff]  }
 0x264   : > { %3999 = vmatprep.subr.bf16.mxu1 %v4286_v2 }
 0x265   : > { %3984 = vmatpush3.bf16.msra.mxu0 %v4714_v9 }
 0x266   : > { %3985 = vmatprep.subr.bf16.mxu0 %v4286_v2 }
 0x269   : > { %3986 = vmatpush3.bf16.msra.mxu0 %v4724_v38 }
 0x26a   : > { %4011 = vmatprep.subr.bf16.mxu0 %v4286_v2 }
 0x26c   : > { %3988 = vmatmul.mubr.msk.bf16.vlgmr.msra.gmra.mrb[72].mxu0 %vm2170_vm4, %v4197_v55 }
 0x26d   : > { %4015 = vmatprep.mubr.msk.bf16.mxu0 %vm4287_vm1, %v4286_v2  ;;  %4012 = vmatpush3.bf16.msra.mxu0 %v4201_v13 }
 0x26e   : > { %4013 = vmatprep.subr.bf16.mxu0 %v4286_v2 }
 0x271   : > { %4014 = vmatpush3.bf16.msra.mxu0 %v4202_v14 }
 0x272   : > { %4019 = vmatprep.subr.bf16.mxu0 %v4286_v2 }
 0x32f   : > { %v2327_v58 = vpop.f32.mrb[68].mxu0  ;;  %v2383_v59 = vpop.f32.mrb[68].mxu1 }
 0x330   : > { %v2384_v60 = vadd.f32 %v2383_v59, %v2327_v58  ;;  %v3969_v62 = vpop.f32.mrb[69].mxu0  ;;  %v3977_v63 = vpop.f32.mrb[69].mxu1  ;;  %v4211_v58 = vld [vmem:[%s5012_s4 + $0x68] sm:$0xff]  }
 0x331   : > { %v2330_v0 = vpop.f32.mrb[70].mxu0  ;;  %v2386_v1 = vpop.f32.mrb[70].mxu1 }
 0x332   : > { %v2387_v3 = vadd.f32 %v2386_v1, %v2330_v0  ;;  %v3970_v4 = vpop.f32.mrb[71].mxu0  ;;  %v3978_v5 = vpop.f32.mrb[71].mxu1 }
 0x33f   : > { %v2435_v6 = vpop.f32.mrb[72].mxu0 }
 0x340   : > { %v3989_v7 = vpop.f32.mrb[73].mxu0 }
 0x341   : > { %v2438_v8 = vpop.f32.mrb[74].mxu0 }
 0x342   : > { %v2442_v10 = vpack.c.bf16 %v2438_v8, %v2435_v6  ;;  %v3990_v11 = vpop.f32.mrb[75].mxu0  ;;  %v4212_v8 = vld [vmem:[%s5011_s3 + $0x38] sm:$0xff]  }
 0x343   : > { %v4214_v11 = vld [vmem:[%s5012_s4 + $0x78] sm:$0xff]  }
 0x344   : > { %3996 = vmatmul.mubr.msk.bf16.vlgmr.msra.gmra.mrb[72].mxu1 %vm539_vm3, %v2442_v10  ;;  %v4213_v10 = vld [vmem:[%s5012_s4 + $0x70] sm:$0xff]  }
 0x345   : > { %4000 = vmatpush3.bf16.msra.mxu1 %v4694_v42  ;;  %4007 = vmatprep.mubr.msk.bf16.mxu1 %vm4287_vm1, %v4286_v2 }
 0x346   : > { %4001 = vmatprep.subr.bf16.mxu1 %v4286_v2 }
 0x349   : > { %4002 = vmatpush3.bf16.msra.mxu1 %v4704_v25 }
 0x34a   : > { %4003 = vmatprep.subr.bf16.mxu1 %v4286_v2 }
 0x34d   : > { %4004 = vmatpush3.bf16.msra.mxu1 %v4714_v9 }
 0x34e   : > { %4005 = vmatprep.subr.bf16.mxu1 %v4286_v2 }
 0x351   : > { %4006 = vmatpush3.bf16.msra.mxu1 %v4724_v38 }
 0x352   : > { %4031 = vmatprep.subr.bf16.mxu1 %v4286_v2 }
 0x354   : > { %4008 = vmatmul.mubr.msk.bf16.vlgmr.msra.gmra.mrb[76].mxu1 %vm2170_vm4, %v4200_v12 }
 0x355   : > { %4035 = vmatprep.mubr.msk.bf16.mxu1 %vm4287_vm1, %v4286_v2  ;;  %4032 = vmatpush3.bf16.msra.mxu1 %v4204_v28 }
 0x356   : > { %4033 = vmatprep.subr.bf16.mxu1 %v4286_v2 }
 0x359   : > { %4034 = vmatpush3.bf16.msra.mxu1 %v4205_v29 }
 0x35a   : > { %4039 = vmatprep.subr.bf16.mxu1 %v4286_v2 }
 0x417   : > { %v2497_v15 = vpop.f32.mrb[72].mxu1 }
 0x418   : > { %v2504_v16 = vadd.f32 %v2497_v15, %v2384_v60  ;;  %v3997_v17 = vpop.f32.mrb[73].mxu1 }
 0x419   : > { %v2500_v18 = vpop.f32.mrb[74].mxu1 }
 0x41a   : > { %v2505_v19 = vadd.f32 %v2500_v18, %v2387_v3  ;;  %v3998_v20 = vpop.f32.mrb[75].mxu1 }
 0x427   : > { %v2551_v21 = vpop.f32.mrb[76].mxu1 }
 0x428   : > { %v4009_v22 = vpop.f32.mrb[77].mxu1 }
 0x429   : > { %v2554_v23 = vpop.f32.mrb[78].mxu1 }
 0x42a   : > { %v2558_v24 = vpack.c.bf16 %v2554_v23, %v2551_v21  ;;  %v4010_v26 = vpop.f32.mrb[79].mxu1  ;;  %v4215_v23 = vld [vmem:[%s5011_s3 + $0x40] sm:$0xff]  }
 0x42c   : > { %4016 = vmatmul.mubr.msk.bf16.vlgmr.msra.gmra.mrb[76].mxu0 %vm539_vm3, %v2558_v24 }
 0x42d   : > { %4020 = vmatpush3.bf16.msra.mxu0 %v4694_v42  ;;  %4027 = vmatprep.mubr.msk.bf16.mxu0 %vm4287_vm1, %v4286_v2 }
 0x42e   : > { %4021 = vmatprep.subr.bf16.mxu0 %v4286_v2 }
 0x431   : > { %4022 = vmatpush3.bf16.msra.mxu0 %v4704_v25 }
 0x432   : > { %4023 = vmatprep.subr.bf16.mxu0 %v4286_v2 }
 0x435   : > { %4024 = vmatpush3.bf16.msra.mxu0 %v4714_v9 }
 0x436   : > { %4025 = vmatprep.subr.bf16.mxu0 %v4286_v2 }
 0x439   : > { %4026 = vmatpush3.bf16.msra.mxu0 %v4724_v38 }
 0x43a   : > { %4051 = vmatprep.subr.bf16.mxu0 %v4286_v2 }
 0x43c   : > { %4028 = vmatmul.mubr.msk.bf16.vlgmr.msra.gmra.mrb[80].mxu0 %vm2170_vm4, %v4203_v27 }
 0x43d   : > { %4055 = vmatprep.mubr.msk.bf16.mxu0 %vm4287_vm1, %v4286_v2  ;;  %4052 = vmatpush3.bf16.msra.mxu0 %v4207_v43 }
 0x43e   : > { %4053 = vmatprep.subr.bf16.mxu0 %v4286_v2 }
 0x441   : > { %4054 = vmatpush3.bf16.msra.mxu0 %v4208_v44 }
 0x442   : > { %4059 = vmatprep.subr.bf16.mxu0 %v4286_v2 }
 0x4ff   : > { %v2613_v30 = vpop.f32.mrb[76].mxu0 }
 0x500   : > { %v2620_v31 = vadd.f32 %v2613_v30, %v2504_v16  ;;  %v4017_v32 = vpop.f32.mrb[77].mxu0 }
 0x501   : > { %v2616_v33 = vpop.f32.mrb[78].mxu0  ;;  %v4218_v32 = vld [vmem:[%s5014_s6] sm:$0xff]  }
 0x502   : > { %v2621_v34 = vadd.f32 %v2616_v33, %v2505_v19  ;;  %v4018_v35 = vpop.f32.mrb[79].mxu0 }
 0x503   : > { %v4219_v35 = vld [vmem:[%s5014_s6 + $0x8] sm:$0xff]  }
 0x50f   : > { %v2667_v36 = vpop.f32.mrb[80].mxu0 }
 0x510   : > { %v4029_v37 = vpop.f32.mrb[81].mxu0 }
 0x511   : > { %v2670_v39 = vpop.f32.mrb[82].mxu0  ;;  %v4221_v37 = vld [vmem:[%s5014_s6 + $0x18] sm:$0xff]  }
 0x512   : > { %v2674_v40 = vpack.c.bf16 %v2670_v39, %v2667_v36  ;;  %v4030_v61 = vpop.f32.mrb[83].mxu0  ;;  %v4220_v36 = vld [vmem:[%s5014_s6 + $0x10] sm:$0xff]  }
 0x514   : > { %4036 = vmatmul.mubr.msk.bf16.vlgmr.msra.gmra.mrb[80].mxu1 %vm539_vm3, %v2674_v40  ;;  %v3593_v40 = vld [vmem:[%s5013_s5] ss:$0 sm:$0xff] }
 0x515   : > { %4040 = vmatpush3.bf16.msra.mxu1 %v4694_v42  ;;  %4047 = vmatprep.mubr.msk.bf16.mxu1 %vm4287_vm1, %v4286_v2 }
 0x516   : > { %4041 = vmatprep.subr.bf16.mxu1 %v4286_v2 }
 0x519   : > { %4042 = vmatpush3.bf16.msra.mxu1 %v4704_v25 }
 0x51a   : > { %4043 = vmatprep.subr.bf16.mxu1 %v4286_v2 }
 0x51d   : > { %4044 = vmatpush3.bf16.msra.mxu1 %v4714_v9 }
 0x51e   : > { %4045 = vmatprep.subr.bf16.mxu1 %v4286_v2 }
 0x521   : > { %4046 = vmatpush3.bf16.msra.mxu1 %v4724_v38 }
 0x522   : > { %4071 = vmatprep.subr.bf16.mxu1 %v4286_v2 }
 0x524   : > { %4048 = vmatmul.mubr.msk.bf16.vlgmr.msra.gmra.mrb[84].mxu1 %vm2170_vm4, %v4206_v41 }
 0x525   : > { %4075 = vmatprep.mubr.msk.bf16.mxu1 %vm4287_vm1, %v4286_v2  ;;  %4072 = vmatpush3.bf16.msra.mxu1 %v4210_v57 }
 0x526   : > { %4073 = vmatprep.subr.bf16.mxu1 %v4286_v2 }
 0x529   : > { %4074 = vmatpush3.bf16.msra.mxu1 %v4211_v58 }
 0x52a   : > { %4079 = vmatprep.subr.bf16.mxu1 %v4286_v2 }
 0x5e7   : > { %v2729_v45 = vpop.f32.mrb[80].mxu1 }
 0x5e8   : > { %v2736_v46 = vadd.f32 %v2729_v45, %v2620_v31  ;;  %v4037_v47 = vpop.f32.mrb[81].mxu1 }
 0x5e9   : > { %v2732_v48 = vpop.f32.mrb[82].mxu1 }
 0x5ea   : > { %v2737_v49 = vadd.f32 %v2732_v48, %v2621_v34  ;;  %v4038_v50 = vpop.f32.mrb[83].mxu1 }
 0x5eb   : > { %v3594_v50 = vld [vmem:[%s5015_s7] ss:$0 sm:$0xff] }
 0x5f7   : > { %v2783_v51 = vpop.f32.mrb[84].mxu1 }
 0x5f8   : > { %v4049_v52 = vpop.f32.mrb[85].mxu1 }
 0x5f9   : > { %v2786_v53 = vpop.f32.mrb[86].mxu1 }
 0x5fa   : > { %v2790_v54 = vpack.c.bf16 %v2786_v53, %v2783_v51  ;;  %v4050_v55 = vpop.f32.mrb[87].mxu1 }
 0x5fc   : > { %4056 = vmatmul.mubr.msk.bf16.vlgmr.msra.gmra.mrb[84].mxu0 %vm539_vm3, %v2790_v54 }
 0x5fd   : > { %4060 = vmatpush3.bf16.msra.mxu0 %v4694_v42  ;;  %4067 = vmatprep.mubr.msk.bf16.mxu0 %vm4287_vm1, %v4286_v2 }
 0x5fe   : > { %4061 = vmatprep.subr.bf16.mxu0 %v4286_v2 }
 0x601   : > { %4062 = vmatpush3.bf16.msra.mxu0 %v4704_v25 }
 0x602   : > { %4063 = vmatprep.subr.bf16.mxu0 %v4286_v2 }
 0x605   : > { %4064 = vmatpush3.bf16.msra.mxu0 %v4714_v9 }
 0x606   : > { %4065 = vmatprep.subr.bf16.mxu0 %v4286_v2 }
 0x609   : > { %4066 = vmatpush3.bf16.msra.mxu0 %v4724_v38 }
 0x60a   : > { %4091 = vmatprep.subr.bf16.mxu0 %v4286_v2 }
 0x60c   : > { %4068 = vmatmul.mubr.msk.bf16.vlgmr.msra.gmra.mrb[88].mxu0 %vm2170_vm4, %v4209_v56 }
 0x60d   : > { %4095 = vmatprep.mubr.msk.bf16.mxu0 %vm4287_vm1, %v4286_v2  ;;  %4092 = vmatpush3.bf16.msra.mxu0 %v4213_v10 }
 0x60e   : > { %4093 = vmatprep.subr.bf16.mxu0 %v4286_v2 }
 0x611   : > { %4094 = vmatpush3.bf16.msra.mxu0 %v4214_v11 }
 0x612   : > { %4099 = vmatprep.subr.bf16.mxu0 %v4286_v2 }
 0x6cf   : > { %v2845_v59 = vpop.f32.mrb[84].mxu0 }
 0x6d0   : > { %v2852_v60 = vadd.f32 %v2845_v59, %v2736_v46  ;;  %v4057_v62 = vpop.f32.mrb[85].mxu0 }
 0x6d1   : > { %v2848_v63 = vpop.f32.mrb[86].mxu0 }
 0x6d2   : > { %v2853_v0 = vadd.f32 %v2848_v63, %v2737_v49  ;;  %v4058_v1 = vpop.f32.mrb[87].mxu0 }
 0x6df   : > { %v2899_v3 = vpop.f32.mrb[88].mxu0 }
 0x6e0   : > { %v4069_v4 = vpop.f32.mrb[89].mxu0 }
 0x6e1   : > { %v2902_v5 = vpop.f32.mrb[90].mxu0 }
 0x6e2   : > { %v2906_v6 = vpack.c.bf16 %v2902_v5, %v2899_v3  ;;  %v4070_v7 = vpop.f32.mrb[91].mxu0 }
 0x6e4   : > { %4076 = vmatmul.mubr.msk.bf16.vlgmr.msra.gmra.mrb[88].mxu1 %vm539_vm3, %v2906_v6 }
 0x6e5   : > { %4080 = vmatpush3.bf16.msra.mxu1 %v4694_v42  ;;  %4087 = vmatprep.mubr.msk.bf16.mxu1 %vm4287_vm1, %v4286_v2 }
 0x6e6   : > { %4081 = vmatprep.subr.bf16.mxu1 %v4286_v2 }
 0x6e9   : > { %4082 = vmatpush3.bf16.msra.mxu1 %v4704_v25 }
 0x6ea   : > { %4083 = vmatprep.subr.bf16.mxu1 %v4286_v2 }
 0x6ed   : > { %4084 = vmatpush3.bf16.msra.mxu1 %v4714_v9 }
 0x6ee   : > { %4085 = vmatprep.subr.bf16.mxu1 %v4286_v2 }
 0x6f1   : > { %4086 = vmatpush3.bf16.msra.mxu1 %v4724_v38 }
 0x6f2   : > { %4111 = vmatprep.subr.bf16.mxu1 %v4286_v2 }
 0x6f4   : > { %4088 = vmatmul.mubr.msk.bf16.vlgmr.msra.gmra.mrb[92].mxu1 %vm2170_vm4, %v4212_v8 }
 0x6f5   : > { %4115 = vmatprep.mubr.msk.bf16.mxu1 %vm4287_vm1, %v4286_v2 }
 0x7b7   : > { %v2961_v12 = vpop.f32.mrb[88].mxu1 }
 0x7b8   : > { %v2968_v13 = vadd.f32 %v2961_v12, %v2852_v60  ;;  %v4077_v14 = vpop.f32.mrb[89].mxu1 }
 0x7b9   : > { %v2964_v15 = vpop.f32.mrb[90].mxu1 }
 0x7ba   : > { %v2969_v16 = vadd.f32 %v2964_v15, %v2853_v0  ;;  %v4078_v17 = vpop.f32.mrb[91].mxu1 }
 0x7c7   : > { %v3015_v18 = vpop.f32.mrb[92].mxu1 }
 0x7c8   : > { %v4089_v19 = vpop.f32.mrb[93].mxu1 }
 0x7c9   : > { %v3018_v20 = vpop.f32.mrb[94].mxu1 }
 0x7ca   : > { %v3022_v21 = vpack.c.bf16 %v3018_v20, %v3015_v18  ;;  %v4090_v22 = vpop.f32.mrb[95].mxu1 }
 0x7cc   : > { %4096 = vmatmul.mubr.msk.bf16.vlgmr.msra.gmra.mrb[92].mxu0 %vm539_vm3, %v3022_v21 }
 0x7cd   : > { %4100 = vmatpush3.bf16.msra.mxu0 %v4694_v42  ;;  %4107 = vmatprep.mubr.msk.bf16.mxu0 %vm4287_vm1, %v4286_v2  ;;  %v4216_v42 = vld [vmem:[%s5012_s4 + $0x80] sm:$0xff]  }
 0x7ce   : > { %4101 = vmatprep.subr.bf16.mxu0 %v4286_v2  ;;  %4112 = vmatpush3.bf16.msra.mxu1 %v4216_v42 }
 0x7cf   : > { %4113 = vmatprep.subr.bf16.mxu1 %v4286_v2 }
 0x7d1   : > { %4102 = vmatpush3.bf16.msra.mxu0 %v4704_v25  ;;  %v4217_v25 = vld [vmem:[%s5012_s4 + $0x88] sm:$0xff]  }
 0x7d2   : > { %4103 = vmatprep.subr.bf16.mxu0 %v4286_v2  ;;  %4114 = vmatpush3.bf16.msra.mxu1 %v4217_v25 }
 0x7d3   : > { %4119 = vmatprep.subr.bf16.mxu1 %v4286_v2 }
 0x7d5   : > { %4104 = vmatpush3.bf16.msra.mxu0 %v4714_v9 }
 0x7d6   : > { %4105 = vmatprep.subr.bf16.mxu0 %v4286_v2 }
 0x7d9   : > { %4106 = vmatpush3.bf16.msra.mxu0 %v4724_v38 }
 0x7dc   : > { %4108 = vmatmul.mubr.msk.bf16.vlgmr.msra.gmra.mrb[96].mxu0 %vm2170_vm4, %v4215_v23 }
 0x89f   : > { %v3077_v9 = vpop.f32.mrb[92].mxu0 }
 0x8a0   : > { %v3084_v24 = vadd.f32 %v3077_v9, %v2968_v13  ;;  %v4097_v26 = vpop.f32.mrb[93].mxu0 }
 0x8a1   : > { %v3080_v38 = vpop.f32.mrb[94].mxu0 }
 0x8a2   : > { %v3085_v27 = vadd.f32 %v3080_v38, %v2969_v16  ;;  %v4098_v28 = vpop.f32.mrb[95].mxu0 }
 0x8af   : > { %v3131_v29 = vpop.f32.mrb[96].mxu0 }
 0x8b0   : > { %v4109_v30 = vpop.f32.mrb[97].mxu0 }
 0x8b1   : > { %v3134_v31 = vpop.f32.mrb[98].mxu0 }
 0x8b2   : > { %v3138_v33 = vpack.c.bf16 %v3134_v31, %v3131_v29  ;;  %v4110_v34 = vpop.f32.mrb[99].mxu0 }
 0x8b4   : > { %4116 = vmatmul.mubr.msk.bf16.vlgmr.msra.gmra.mrb[96].mxu1 %vm539_vm3, %v3138_v33 }
 0x8b5   : > { %4120 = vmatpush3.bf16.msra.mxu1 %v4218_v32  ;;  %4127 = vmatprep.mubr.msk.bf16.mxu1 %vm4287_vm1, %v4286_v2 }
 0x8b6   : > { %4121 = vmatprep.subr.bf16.mxu1 %v4286_v2 }
 0x8b9   : > { %4122 = vmatpush3.bf16.msra.mxu1 %v4219_v35 }
 0x8ba   : > { %4123 = vmatprep.subr.bf16.mxu1 %v4286_v2 }
 0x8bd   : > { %4124 = vmatpush3.bf16.msra.mxu1 %v4220_v36 }
 0x8be   : > { %4125 = vmatprep.subr.bf16.mxu1 %v4286_v2 }
 0x8c1   : > { %4126 = vmatpush3.bf16.msra.mxu1 %v4221_v37 }
 0x987   : > { %v3193_v39 = vpop.f32.mrb[96].mxu1 }
 0x988   : > { %v3200_v61 = vadd.f32 %v3193_v39, %v3084_v24  ;;  %v4117_v41 = vpop.f32.mrb[97].mxu1 }
 0x989   : > { %v3196_v43 = vpop.f32.mrb[98].mxu1 }
 0x98a   : > { %v3209_v44 = vadd.f32 %v3593_v40, %v3200_v61  ;;  %v3201_v45 = vadd.f32 %v3196_v43, %v3085_v27  ;;  %v4118_v46 = vpop.f32.mrb[99].mxu1 }
 0x98c   : > { %v3210_v47 = vadd.f32 %v3593_v40, %v3201_v45  ;;  %v3211_v2 = vmax.f32 %v3209_v44, 0.0 }
 0x98e   : > { %v3212_v48 = vmax.f32 %v3210_v47, 0.0 }
 0x990   : > { %v3213_v49 = vpack.c.bf16 %v3212_v48, %v3211_v2 }
 0x992   : > { %4128 = vmatmul.mubr.msk.bf16.vlgmr.msra.gmra.mrb[100].mxu1 %vm2170_vm4, %v3213_v49 }
 0xa65   : > { %v3290_v51 = vpop.f32.mrb[100].mxu1 }
 0xa66   : > { %v3291_v52 = vadd.f32 %v3594_v50, %v3290_v51  ;;  %v4129_v53 = vpop.f32.mrb[101].mxu1 }
 0xa67   : > { %v3293_v54 = vpop.f32.mrb[102].mxu1 }
 0xa68   : > { %3298 = vst.msk [vmem:[%s298_s17] sm:$0xff] %vm3297_vm5, %v3291_v52  ;;  %v3294_v55 = vadd.f32 %v3594_v50, %v3293_v54  ;;  %v4130_v56 = vpop.f32.mrb[103].mxu1 }
 0xa6a   : > { %3299 = vst.msk [vmem:[%s298_s17 + $0x8] sm:$0xff] %vm3297_vm5, %v3294_v55 }
 0xa6b   : > { %4235 = shalt.err (!%p4232_p3)
}
 0xa6c   : > { %s4236_s25 = scalar_lea.hbm %s4965_s22, 256  ;;  %s4240_s17 = scalar_lea.hbm %s5016_s8, 512 }
 0xa6d   : > { %p4237_p4 = scmp.ne.s32.totalorder %s4965_s22, %s4236_s25  ;;  %p4241_p9 = scmp.lt.u32.totalorder %s4965_s22, %s5016_s8 }
 0xa6e   : > { %p4242_p10 = scmp.lt.u32.totalorder %s4240_s17, %s4236_s25  ;;  %p4244_p12 = scmp.lt.u32.totalorder %s4236_s25, %s4965_s22 }
 0xa6f   : > { %p4238_p7 = pnand %p4237_p4, %p4374_p5 }
 0xa70   : > { %p4243_p11 = por %p4242_p10, %p4241_p9 }
 0xa71   : > { %p4239_p8 = pneg %p4238_p7 }
 0xa72   : > { %p4245_p13 = por %p4244_p12, %p4243_p11 }
 0xa74   : > { %p4246_p0 = pnand %p4245_p13, %p4239_p8 }
 0xa76   : > { %4249 = shalt.err (!%p4246_p0)
}
 0xa77   : > { %s4289_s21 = smov 128   ;;  %s4290_s23 = smov 8  }
 0xa78   : > { %4132 = dma.vmem_to_hbm [thread:$0]  (%p4374_p5), %s4960_s18, 256, %s4965_s22, %s4967_s9, %s4289_s21, %s4289_s21, %s4290_s23  }
 0xa79 PF: > { %p4138_p1 = scmp.ge.s32.totalorder %s4284_s30, 2  ;;  %s3329_s24 = sand.u32 1, %s4272_s27  }
 0xa7a   : > { %s3330_s10 = scalar_lea.sflag [#allocation4], %s3329_s24 }
 0xa7b   : > { %p4135_p2 = pnand %p4138_p1, %p4378_p6 }
 0xa7d   : > { %4267 = dma.done.wait (!%p4135_p2), %s3330_s10, 256  }
 0xa7e   : > { %4269 = vsyncadd (!%p4135_p2), %s3330_s10, 4294967040  ;;  %p18_p3 = scmp.ge.s32.totalorder %s4361_s11, 4   ;;  %s5019_s27 = smov %s4276_s28 }
 0xa7f   : > { %s5020_s28 = smov %s4280_s29  ;;  %s5021_s29 = smov %s4372_s14 }
 0xa80   : > { %s5022_s30 = smov %s4361_s11  ;;  %20 = sbr.rel (!%p18_p3) target bundleno = 3 (0x3), region = 114 }
 0xa87   :  { %3335 = vsyncpa [#allocation4], 1 }
 0xa88   :  { %3337 = vsyncpa [#allocation4 + $0x1], 1 }

</bundles_post_ra>
